<compile_context>
chip_gen: v5e
topology: v5e:2x2
jax: 0.10.0
libtpu: 0.0.40
codegen_flags: <defaults>
</compile_context>

<pallas_src>
import functools

import jax
import jax.numpy as jnp
from jax.experimental import pallas as pl
from jax.experimental.pallas import tpu as pltpu

BN_EPS = 1e-5
# Portable across v5e/v6e (128 MiB VMEM) and v7x (64 MiB/TC). Per-step usage of the
# default tilings below is well under 2 MiB, so raising this (64-96 MiB on v5e/v6e per
# review) only matters once larger TM / channel tilings are used.
VMEM_LIMIT_BYTES = 32 * 1024 * 1024
NSPLIT = 2  # pass-1 "parallel" leading grid axis -> v7x megacore shards the stats pass


def _stats_kernel(p_ref, w_ref, sum_ref, sq_ref):
    """Pass 1 (fused path): MXU matmul, keep only per-channel sum / sum-of-squares."""
    @pl.when(pl.program_id(1) == 0)
    def _init():
        sum_ref[...] = jnp.zeros_like(sum_ref)
        sq_ref[...] = jnp.zeros_like(sq_ref)

    y = jnp.dot(p_ref[...], w_ref[...], preferred_element_type=jnp.float32)
    sum_ref[...] += jnp.sum(y, axis=0, keepdims=True)
    sq_ref[...] += jnp.sum(y * y, axis=0, keepdims=True)


def _matmul_stats_kernel(p_ref, w_ref, y_ref, sum_ref, sq_ref):
    """Pass 1 (two-pass path): matmul, bf16 y writeback, per-channel stats."""
    @pl.when(pl.program_id(1) == 0)
    def _init():
        sum_ref[...] = jnp.zeros_like(sum_ref)
        sq_ref[...] = jnp.zeros_like(sq_ref)

    y = jnp.dot(p_ref[...], w_ref[...], preferred_element_type=jnp.float32)
    y_ref[...] = y.astype(y_ref.dtype)          # bf16: halves the y HBM round-trip
    sum_ref[...] += jnp.sum(y, axis=0, keepdims=True)
    sq_ref[...] += jnp.sum(y * y, axis=0, keepdims=True)


def _bn_affine(sum_v, sq_v, gamma, beta, inv_count):
    # E[y^2]-E[y]^2 in f32 with a clamp at 0.
    # TODO(synk): Welford/shifted combine if very large M ever shows cancellation.
    mean = sum_v * inv_count
    var = jnp.maximum(sq_v * inv_count - mean * mean, 0.0)
    a = gamma * jax.lax.rsqrt(var + BN_EPS)
    b = beta - mean * a
    return a, b


def _matmul_bn_kernel(p_ref, w_ref, sum_ref, sq_ref, gamma_ref, beta_ref, o_ref, *,
                      inv_count):
    """Pass 2 (fused path): recompute the matmul and apply y*a + b."""
    a, b = _bn_affine(sum_ref[...], sq_ref[...], gamma_ref[...], beta_ref[...], inv_count)
    y = jnp.dot(p_ref[...], w_ref[...], preferred_element_type=jnp.float32)
    o_ref[...] = (y * a + b).astype(o_ref.dtype)


def _bn_apply_kernel(y_ref, sum_ref, sq_ref, gamma_ref, beta_ref, o_ref, *, inv_count):
    """Pass 2 (two-pass path): stream bf16 y, apply y*a + b."""
    a, b = _bn_affine(sum_ref[...], sq_ref[...], gamma_ref[...], beta_ref[...], inv_count)
    o_ref[...] = (y_ref[...].astype(jnp.float32) * a + b).astype(o_ref.dtype)


def deconv_bn_forward(x, weight, bias, gamma, beta, *, stride, padding,
                      tile_m=512, mode="auto"):
    """x: (N, Cin, H, W) NCHW.  weight: (Cin, Cout, kH, kW) (ConvTranspose2d layout).

    `bias` is accepted for interface parity; a per-channel constant added before a
    training-mode BatchNorm is exactly cancelled by the mean subtraction, so it never
    reaches the kernels.  Returns (N, Cout, OH, OW) float32.
    """
    del bias  # exactly cancelled by BN mean subtraction
    assert mode in ("auto", "fused", "two_pass")
    N, Cin, H, W_in = x.shape
    Cin_w, Cout, kH, kW = weight.shape
    assert Cin_w == Cin
    assert 0 <= padding <= min(kH, kW) - 1, "padding > kernel-1 not supported"
    # TODO(synk): output_padding != 0 is not supported.

    OH = (H - 1) * stride - 2 * padding + kH
    OW = (W_in - 1) * stride - 2 * padding + kW

    # ---- glue (bf16 end-to-end): zero-insert (stride), pad, im2col (kh,kw,ci)-minor ----
    x_nhwc = jnp.transpose(x, (0, 2, 3, 1)).astype(jnp.bfloat16)
    Hd = (H - 1) * stride + 1
    Wd = (W_in - 1) * stride + 1
    x_dil = jnp.zeros((N, Hd, Wd, Cin), jnp.bfloat16).at[:, ::stride, ::stride, :].set(x_nhwc)
    ph = kH - 1 - padding
    pw = kW - 1 - padding
    xpad = jnp.pad(x_dil, ((0, 0), (ph, ph), (pw, pw), (0, 0)))
    patches = jnp.concatenate(
        [xpad[:, kh:kh + OH, kw:kw + OW, :] for kh in range(kH) for kw in range(kW)],
        axis=-1,
    )                                                   # (N, OH, OW, kH*kW*Cin) bf16
    K = kH * kW * Cin
    M = N * OH * OW
    P = patches.reshape(M, K)

    # Equivalent forward-conv weight flattened in (kh, kw, ci)-major order -> (K, Cout).
    w_conv = jnp.transpose(weight, (1, 0, 2, 3))[:, :, ::-1, ::-1]   # (Cout, Cin, kH, kW)
    W2 = jnp.transpose(w_conv, (2, 3, 1, 0)).reshape(K, Cout).astype(jnp.bfloat16)

    # ---- lane-dense padding: K and Cout to multiples of 128, M to the tile grid ----
    K_pad = ((K + 127) // 128) * 128
    Cp = ((Cout + 127) // 128) * 128

    assert tile_m % 8 == 0
    TM1 = tile_m
    while TM1 > 8 and 2 * TM1 > M:       # keep row padding bounded for tiny problems
        TM1 //= 2
    TM1 = max(8, TM1)
    TM2 = 2 * TM1                        # pass 2 streams; bigger tile amortizes step cost
    M_pad = -(-M // TM2) * TM2           # multiple of TM2 and of NSPLIT*TM1
    tiles1 = M_pad // TM1
    tps = tiles1 // NSPLIT
    tiles2 = M_pad // TM2

    P = jnp.pad(P, ((0, M_pad - M), (0, K_pad - K)))
    W2 = jnp.pad(W2, ((0, K_pad - K), (0, Cp - Cout)))
    g2 = jnp.pad(gamma.astype(jnp.float32).reshape(1, Cout), ((0, 0), (0, Cp - Cout)))
    b2 = jnp.pad(beta.astype(jnp.float32).reshape(1, Cout), ((0, 0), (0, Cp - Cout)))

    # Re-reading P in pass 2 costs K_pad*2 bytes/row; writing + reading a bf16 y costs
    # 2*Cp*2 bytes/row -> fuse (recompute the matmul) when K_pad < 2*Cp.
    fused = mode == "fused" or (mode == "auto" and K_pad < 2 * Cp)

    p_spec1 = pl.BlockSpec((TM1, K_pad), lambda c, i, t=tps: (c * t + i, 0))
    w_spec1 = pl.BlockSpec((K_pad, Cp), lambda c, i: (0, 0))
    stat_spec = pl.BlockSpec((None, 1, Cp), lambda c, i: (c, 0, 0))
    stats_shape = jax.ShapeDtypeStruct((NSPLIT, 1, Cp), jnp.float32)
    params1 = pltpu.CompilerParams(
        dimension_semantics=("parallel", "arbitrary"),   # split axis megacore-shardable
        vmem_limit_bytes=VMEM_LIMIT_BYTES)
    mm_flops = 2 * M_pad * K_pad * Cp

    # ---- pass 1: BN statistics (optionally also the bf16 y intermediate) ----
    if fused:
        sums_p, sqs_p = pl.pallas_call(
            _stats_kernel,
            out_shape=(stats_shape, stats_shape),
            grid=(NSPLIT, tps),
            in_specs=[p_spec1, w_spec1],
            out_specs=(stat_spec, stat_spec),
            compiler_params=params1,
            cost_estimate=pl.CostEstimate(
                flops=mm_flops, transcendentals=0,
                bytes_accessed=M_pad * K_pad * 2 + K_pad * Cp * 2 + 2 * NSPLIT * Cp * 4),
        )(P, W2)
        y_full = None
    else:
        y_full, sums_p, sqs_p = pl.pallas_call(
            _matmul_stats_kernel,
            out_shape=(jax.ShapeDtypeStruct((M_pad, Cp), jnp.bfloat16),
                       stats_shape, stats_shape),
            grid=(NSPLIT, tps),
            in_specs=[p_spec1, w_spec1],
            out_specs=(pl.BlockSpec((TM1, Cp), lambda c, i, t=tps: (c * t + i, 0)),
                       stat_spec, stat_spec),
            compiler_params=params1,
            cost_estimate=pl.CostEstimate(
                flops=mm_flops, transcendentals=0,
                bytes_accessed=(M_pad * K_pad * 2 + K_pad * Cp * 2
                                + M_pad * Cp * 2 + 2 * NSPLIT * Cp * 4)),
        )(P, W2)

    sums = jnp.sum(sums_p, axis=0)       # (1, Cp): reduce per-split partial stats
    sqs = jnp.sum(sqs_p, axis=0)

    # Padded rows of P are all-zero and no bias is added pre-BN, so they contribute
    # exactly 0 to the sums; divide by the true M.
    inv_count = 1.0 / float(M)
    vec_spec = pl.BlockSpec((1, Cp), lambda i: (0, 0))
    params2 = pltpu.CompilerParams(
        dimension_semantics=("parallel",), vmem_limit_bytes=VMEM_LIMIT_BYTES)
    out_shape2 = jax.ShapeDtypeStruct((M_pad, Cp), jnp.float32)
    o_spec2 = pl.BlockSpec((TM2, Cp), lambda i: (i, 0))

    # ---- pass 2: normalize every tile with the global batch statistics ----
    if fused:
        out_mat = pl.pallas_call(
            functools.partial(_matmul_bn_kernel, inv_count=inv_count),
            out_shape=out_shape2,
            grid=(tiles2,),
            in_specs=[pl.BlockSpec((TM2, K_pad), lambda i: (i, 0)),
                      pl.BlockSpec((K_pad, Cp), lambda i: (0, 0)),
                      vec_spec, vec_spec, vec_spec, vec_spec],
            out_specs=o_spec2,
            compiler_params=params2,
            cost_estimate=pl.CostEstimate(
                flops=mm_flops + 2 * M_pad * Cp, transcendentals=Cp,
                bytes_accessed=(M_pad * K_pad * 2 + K_pad * Cp * 2
                                + M_pad * Cp * 4 + 4 * Cp * 4)),
        )(P, W2, sums, sqs, g2, b2)
    else:
        out_mat = pl.pallas_call(
            functools.partial(_bn_apply_kernel, inv_count=inv_count),
            out_shape=out_shape2,
            grid=(tiles2,),
            in_specs=[pl.BlockSpec((TM2, Cp), lambda i: (i, 0)),
                      vec_spec, vec_spec, vec_spec, vec_spec],
            out_specs=o_spec2,
            compiler_params=params2,
            cost_estimate=pl.CostEstimate(
                flops=2 * M_pad * Cp, transcendentals=Cp,
                bytes_accessed=M_pad * Cp * 2 + M_pad * Cp * 4 + 4 * Cp * 4),
        )(y_full, sums, sqs, g2, b2)

    # Back to NCHW (module contract); slice off row/channel padding.
    out = out_mat[:M, :Cout].reshape(N, OH, OW, Cout)
    return jnp.transpose(out, (0, 3, 1, 2))


if __name__ == "__main__":
    # Module config (synthetic, deterministic init — no checkpoint load).
    in_channels, out_channels = 4, 8
    kernel_size, stride, padding = 3, 2, 1
    N, H, W = 2, 16, 16

    key = jax.random.PRNGKey(0)
    kx, kw, kb, kg, kbt = jax.random.split(key, 5)

    x = jax.random.normal(kx, (N, in_channels, H, W), jnp.float32)
    # ConvTranspose2d weight layout: (in_channels, out_channels, kH, kW)
    weight = jax.random.normal(
        kw, (in_channels, out_channels, kernel_size, kernel_size), jnp.float32) * 0.1
    bias = jax.random.normal(kb, (out_channels,), jnp.float32) * 0.1
    gamma = 1.0 + 0.1 * jax.random.normal(kg, (out_channels,), jnp.float32)
    beta = 0.1 * jax.random.normal(kbt, (out_channels,), jnp.float32)

    OH = (H - 1) * stride - 2 * padding + kernel_size
    OW = (W - 1) * stride - 2 * padding + kernel_size

    # f32 reference: ConvTranspose2d (incl. bias) + training-mode BatchNorm2d.
    w_conv = jnp.transpose(weight, (1, 0, 2, 3))[:, :, ::-1, ::-1]   # (Cout, Cin, kH, kW)
    pad = kernel_size - 1 - padding
    y = jax.lax.conv_general_dilated(
        x, w_conv, window_strides=(1, 1), padding=[(pad, pad), (pad, pad)],
        lhs_dilation=(stride, stride), rhs_dilation=(1, 1),
        dimension_numbers=("NCHW", "OIHW", "NCHW"))
    y = y + bias[None, :, None, None]
    mean = jnp.mean(y, axis=(0, 2, 3), keepdims=True)
    var = jnp.mean((y - mean) ** 2, axis=(0, 2, 3), keepdims=True)
    ref = (y - mean) * jax.lax.rsqrt(var + BN_EPS) * gamma[None, :, None, None] \
        + beta[None, :, None, None]

    # Exercise both the fused (default for these shapes) and the streaming two-pass path.
    for md in ("auto", "two_pass"):
        fwd = jax.jit(functools.partial(
            deconv_bn_forward, stride=stride, padding=padding, mode=md))
        out = fwd(x, weight, bias, gamma, beta)
        jax.block_until_ready(out)
        assert out.shape == (N, out_channels, OH, OW), out.shape
        err = float(jnp.max(jnp.abs(out - ref)))
        assert err < 0.15, f"mode={md}: max abs err vs f32 reference: {err}"

    print("KERNEL_OK")
</pallas_src>

<mosaic_0001>
module attributes {stable_mosaic.version = 11 : i64} {
  func.func @_stats_kernel(%arg0: i32, %arg1: i32, %arg2: memref<512x128xbf16, #tpu.memory_space<vmem>>, %arg3: memref<128x128xbf16, #tpu.memory_space<vmem>>, %arg4: memref<1x1x128xf32, #tpu.memory_space<vmem>>, %arg5: memref<1x1x128xf32, #tpu.memory_space<vmem>>) attributes {dimension_semantics = [#tpu.dimension_semantics<parallel>, #tpu.dimension_semantics<arbitrary>], iteration_bounds = array<i64: 2, 2>, scalar_prefetch = 0 : i64, scratch_operands = 0 : i64, tpu.core_type = #tpu.core_type<tc>, window_params = [{transform_indices = @transform_0, window_bounds = array<i64: 512, 128>}, {pipeline_mode = #tpu.pipeline_mode<synchronous>, transform_indices = @transform_1, window_bounds = array<i64: 128, 128>}, {transform_indices = @transform_2, window_bounds = array<i64: 1, 1, 128>}, {transform_indices = @transform_3, window_bounds = array<i64: 1, 1, 128>}]} {
    %c0_i32 = arith.constant 0 : i32
    %0 = arith.cmpi eq, %arg1, %c0_i32 : i32
    %1 = arith.extui %0 : i1 to i32
    %c0_i32_0 = arith.constant 0 : i32
    %2 = arith.cmpi ne, %1, %c0_i32_0 : i32
    scf.if %2 {
      %cst_18 = arith.constant 0.000000e+00 : f32
      %23 = vector.broadcast %cst_18 : f32 to vector<1x128xf32>
      %c0_19 = arith.constant 0 : index
      %c0_20 = arith.constant 0 : index
      %c0_21 = arith.constant 0 : index
      %24 = vector.load %arg4[%c0_19, %c0_20, %c0_21] : memref<1x1x128xf32, #tpu.memory_space<vmem>>, vector<1x1x128xf32>
      %25 = vector.shape_cast %24 : vector<1x1x128xf32> to vector<1x128xf32>
      %26 = vector.shape_cast %23 : vector<1x128xf32> to vector<1x1x128xf32>
      tpu.vector_store %arg4[%c0_19, %c0_20, %c0_21], %26 {strides = array<i32>} : memref<1x1x128xf32, #tpu.memory_space<vmem>>, vector<1x1x128xf32>,
      %cst_22 = arith.constant 0.000000e+00 : f32
      %27 = vector.broadcast %cst_22 : f32 to vector<1x128xf32>
      %c0_23 = arith.constant 0 : index
      %c0_24 = arith.constant 0 : index
      %c0_25 = arith.constant 0 : index
      %28 = vector.load %arg5[%c0_23, %c0_24, %c0_25] : memref<1x1x128xf32, #tpu.memory_space<vmem>>, vector<1x1x128xf32>
      %29 = vector.shape_cast %28 : vector<1x1x128xf32> to vector<1x128xf32>
      %30 = vector.shape_cast %27 : vector<1x128xf32> to vector<1x1x128xf32>
      tpu.vector_store %arg5[%c0_23, %c0_24, %c0_25], %30 {strides = array<i32>} : memref<1x1x128xf32, #tpu.memory_space<vmem>>, vector<1x1x128xf32>,
    } else {
    }
    %c0 = arith.constant 0 : index
    %c0_1 = arith.constant 0 : index
    %3 = vector.load %arg2[%c0, %c0_1] : memref<512x128xbf16, #tpu.memory_space<vmem>>, vector<512x128xbf16>
    %c0_2 = arith.constant 0 : index
    %c0_3 = arith.constant 0 : index
    %4 = vector.load %arg3[%c0_2, %c0_3] : memref<128x128xbf16, #tpu.memory_space<vmem>>, vector<128x128xbf16>
    %cst = arith.constant dense<0.000000e+00> : vector<512x128xf32>
    %5 = tpu.matmul %3, %4, %cst {dimension_numbers = #tpu.dot_dimension_numbers<[1], [0], [0], [1], [0, 0, 1, 1], [], []>} : vector<512x128xbf16>, vector<128x128xbf16>, vector<512x128xf32> -> vector<512x128xf32>
    %c0_4 = arith.constant 0 : index
    %c0_5 = arith.constant 0 : index
    %c0_6 = arith.constant 0 : index
    %6 = vector.load %arg4[%c0_4, %c0_5, %c0_6] : memref<1x1x128xf32, #tpu.memory_space<vmem>>, vector<1x1x128xf32>
    %7 = vector.shape_cast %6 : vector<1x1x128xf32> to vector<1x128xf32>
    %cst_7 = arith.constant dense<0.000000e+00> : vector<128xf32>
    %8 = vector.multi_reduction <add>, %5, %cst_7 [0] : vector<512x128xf32> to vector<128xf32>
    %9 = vector.shape_cast %8 : vector<128xf32> to vector<1x128xf32>
    %10 = arith.addf %7, %9 : vector<1x128xf32>
    %c0_8 = arith.constant 0 : index
    %c0_9 = arith.constant 0 : index
    %c0_10 = arith.constant 0 : index
    %11 = vector.load %arg4[%c0_8, %c0_9, %c0_10] : memref<1x1x128xf32, #tpu.memory_space<vmem>>, vector<1x1x128xf32>
    %12 = vector.shape_cast %11 : vector<1x1x128xf32> to vector<1x128xf32>
    %13 = vector.shape_cast %10 : vector<1x128xf32> to vector<1x1x128xf32>
    tpu.vector_store %arg4[%c0_8, %c0_9, %c0_10], %13 {strides = array<i32>} : memref<1x1x128xf32, #tpu.memory_space<vmem>>, vector<1x1x128xf32>,
    %c0_11 = arith.constant 0 : index
    %c0_12 = arith.constant 0 : index
    %c0_13 = arith.constant 0 : index
    %14 = vector.load %arg5[%c0_11, %c0_12, %c0_13] : memref<1x1x128xf32, #tpu.memory_space<vmem>>, vector<1x1x128xf32>
    %15 = vector.shape_cast %14 : vector<1x1x128xf32> to vector<1x128xf32>
    %16 = arith.mulf %5, %5 : vector<512x128xf32>
    %cst_14 = arith.constant dense<0.000000e+00> : vector<128xf32>
    %17 = vector.multi_reduction <add>, %16, %cst_14 [0] : vector<512x128xf32> to vector<128xf32>
    %18 = vector.shape_cast %17 : vector<128xf32> to vector<1x128xf32>
    %19 = arith.addf %15, %18 : vector<1x128xf32>
    %c0_15 = arith.constant 0 : index
    %c0_16 = arith.constant 0 : index
    %c0_17 = arith.constant 0 : index
    %20 = vector.load %arg5[%c0_15, %c0_16, %c0_17] : memref<1x1x128xf32, #tpu.memory_space<vmem>>, vector<1x1x128xf32>
    %21 = vector.shape_cast %20 : vector<1x1x128xf32> to vector<1x128xf32>
    %22 = vector.shape_cast %19 : vector<1x128xf32> to vector<1x1x128xf32>
    tpu.vector_store %arg5[%c0_15, %c0_16, %c0_17], %22 {strides = array<i32>} : memref<1x1x128xf32, #tpu.memory_space<vmem>>, vector<1x1x128xf32>,
    return
  }
  func.func @transform_0(%arg0: i32, %arg1: i32) -> (i32, i32) {
    %c2_i32 = arith.constant 2 : i32
    %0 = arith.muli %arg0, %c2_i32 : i32
    %1 = arith.addi %0, %arg1 : i32
    %c0_i32 = arith.constant 0 : i32
    %c0_i32_0 = arith.constant 0 : i32
    return %1, %c0_i32 : i32, i32
  }
  func.func @transform_1(%arg0: i32, %arg1: i32) -> (i32, i32) {
    %c0_i32 = arith.constant 0 : i32
    %c0_i32_0 = arith.constant 0 : i32
    %c0_i32_1 = arith.constant 0 : i32
    return %c0_i32, %c0_i32_0 : i32, i32
  }
  func.func @transform_2(%arg0: i32, %arg1: i32) -> (i32, i32, i32) {
    %c0_i32 = arith.constant 0 : i32
    %c0_i32_0 = arith.constant 0 : i32
    %c0_i32_1 = arith.constant 0 : i32
    return %arg0, %c0_i32, %c0_i32_0 : i32, i32, i32
  }
  func.func @transform_3(%arg0: i32, %arg1: i32) -> (i32, i32, i32) {
    %c0_i32 = arith.constant 0 : i32
    %c0_i32_0 = arith.constant 0 : i32
    %c0_i32_1 = arith.constant 0 : i32
    return %arg0, %c0_i32, %c0_i32_0 : i32, i32, i32
  }
}

module attributes {stable_mosaic.version = 11 : i64} {
  func.func @_matmul_bn_kernel(%arg0: i32, %arg1: memref<1024x128xbf16, #tpu.memory_space<vmem>>, %arg2: memref<128x128xbf16, #tpu.memory_space<vmem>>, %arg3: memref<1x128xf32, #tpu.memory_space<vmem>>, %arg4: memref<1x128xf32, #tpu.memory_space<vmem>>, %arg5: memref<1x128xf32, #tpu.memory_space<vmem>>, %arg6: memref<1x128xf32, #tpu.memory_space<vmem>>, %arg7: memref<1024x128xf32, #tpu.memory_space<vmem>>) attributes {dimension_semantics = [#tpu.dimension_semantics<parallel>], iteration_bounds = array<i64: 2>, scalar_prefetch = 0 : i64, scratch_operands = 0 : i64, tpu.core_type = #tpu.core_type<tc>, window_params = [{transform_indices = @transform_0, window_bounds = array<i64: 1024, 128>}, {pipeline_mode = #tpu.pipeline_mode<synchronous>, transform_indices = @transform_1, window_bounds = array<i64: 128, 128>}, {pipeline_mode = #tpu.pipeline_mode<synchronous>, transform_indices = @transform_2, window_bounds = array<i64: 1, 128>}, {pipeline_mode = #tpu.pipeline_mode<synchronous>, transform_indices = @transform_3, window_bounds = array<i64: 1, 128>}, {pipeline_mode = #tpu.pipeline_mode<synchronous>, transform_indices = @transform_4, window_bounds = array<i64: 1, 128>}, {pipeline_mode = #tpu.pipeline_mode<synchronous>, transform_indices = @transform_5, window_bounds = array<i64: 1, 128>}, {transform_indices = @transform_6, window_bounds = array<i64: 1024, 128>}]} {
    %c0 = arith.constant 0 : index
    %c0_0 = arith.constant 0 : index
    %0 = vector.load %arg3[%c0, %c0_0] : memref<1x128xf32, #tpu.memory_space<vmem>>, vector<1x128xf32>
    %c0_1 = arith.constant 0 : index
    %c0_2 = arith.constant 0 : index
    %1 = vector.load %arg4[%c0_1, %c0_2] : memref<1x128xf32, #tpu.memory_space<vmem>>, vector<1x128xf32>
    %c0_3 = arith.constant 0 : index
    %c0_4 = arith.constant 0 : index
    %2 = vector.load %arg5[%c0_3, %c0_4] : memref<1x128xf32, #tpu.memory_space<vmem>>, vector<1x128xf32>
    %c0_5 = arith.constant 0 : index
    %c0_6 = arith.constant 0 : index
    %3 = vector.load %arg6[%c0_5, %c0_6] : memref<1x128xf32, #tpu.memory_space<vmem>>, vector<1x128xf32>
    %cst = arith.constant 5.20291389E-4 : f32
    %4 = vector.broadcast %cst : f32 to vector<1x128xf32>
    %5 = arith.mulf %0, %4 : vector<1x128xf32>
    %cst_7 = arith.constant 5.20291389E-4 : f32
    %6 = vector.broadcast %cst_7 : f32 to vector<1x128xf32>
    %7 = arith.mulf %1, %6 : vector<1x128xf32>
    %8 = arith.mulf %5, %5 : vector<1x128xf32>
    %9 = arith.subf %7, %8 : vector<1x128xf32>
    %cst_8 = arith.constant 0.000000e+00 : f32
    %10 = vector.broadcast %cst_8 : f32 to vector<1x128xf32>
    %11 = arith.maximumf %9, %10 : vector<1x128xf32>
    %cst_9 = arith.constant 9.99999974E-6 : f32
    %12 = vector.broadcast %cst_9 : f32 to vector<1x128xf32>
    %13 = arith.addf %11, %12 : vector<1x128xf32>
    %14 = math.rsqrt %13 : vector<1x128xf32>
    %15 = arith.mulf %2, %14 : vector<1x128xf32>
    %16 = arith.mulf %5, %15 : vector<1x128xf32>
    %17 = arith.subf %3, %16 : vector<1x128xf32>
    %c0_10 = arith.constant 0 : index
    %c0_11 = arith.constant 0 : index
    %18 = vector.load %arg1[%c0_10, %c0_11] : memref<1024x128xbf16, #tpu.memory_space<vmem>>, vector<1024x128xbf16>
    %c0_12 = arith.constant 0 : index
    %c0_13 = arith.constant 0 : index
    %19 = vector.load %arg2[%c0_12, %c0_13] : memref<128x128xbf16, #tpu.memory_space<vmem>>, vector<128x128xbf16>
    %cst_14 = arith.constant dense<0.000000e+00> : vector<1024x128xf32>
    %20 = tpu.matmul %18, %19, %cst_14 {dimension_numbers = #tpu.dot_dimension_numbers<[1], [0], [0], [1], [0, 0, 1, 1], [], []>} : vector<1024x128xbf16>, vector<128x128xbf16>, vector<1024x128xf32> -> vector<1024x128xf32>
    %21 = vector.broadcast %15 : vector<1x128xf32> to vector<1024x128xf32>
    %22 = arith.mulf %20, %21 : vector<1024x128xf32>
    %23 = vector.broadcast %17 : vector<1x128xf32> to vector<1024x128xf32>
    %24 = arith.addf %22, %23 : vector<1024x128xf32>
    %c0_15 = arith.constant 0 : index
    %c0_16 = arith.constant 0 : index
    %25 = vector.load %arg7[%c0_15, %c0_16] : memref<1024x128xf32, #tpu.memory_space<vmem>>, vector<1024x128xf32>
    tpu.vector_store %arg7[%c0_15, %c0_16], %24 {strides = array<i32>} : memref<1024x128xf32, #tpu.memory_space<vmem>>, vector<1024x128xf32>,
    return
  }
  func.func @transform_0(%arg0: i32) -> (i32, i32) {
    %c0_i32 = arith.constant 0 : i32
    %c0_i32_0 = arith.constant 0 : i32
    return %arg0, %c0_i32 : i32, i32
  }
  func.func @transform_1(%arg0: i32) -> (i32, i32) {
    %c0_i32 = arith.constant 0 : i32
    %c0_i32_0 = arith.constant 0 : i32
    %c0_i32_1 = arith.constant 0 : i32
    return %c0_i32, %c0_i32_0 : i32, i32
  }
  func.func @transform_2(%arg0: i32) -> (i32, i32) {
    %c0_i32 = arith.constant 0 : i32
    %c0_i32_0 = arith.constant 0 : i32
    %c0_i32_1 = arith.constant 0 : i32
    return %c0_i32, %c0_i32_0 : i32, i32
  }
  func.func @transform_3(%arg0: i32) -> (i32, i32) {
    %c0_i32 = arith.constant 0 : i32
    %c0_i32_0 = arith.constant 0 : i32
    %c0_i32_1 = arith.constant 0 : i32
    return %c0_i32, %c0_i32_0 : i32, i32
  }
  func.func @transform_4(%arg0: i32) -> (i32, i32) {
    %c0_i32 = arith.constant 0 : i32
    %c0_i32_0 = arith.constant 0 : i32
    %c0_i32_1 = arith.constant 0 : i32
    return %c0_i32, %c0_i32_0 : i32, i32
  }
  func.func @transform_5(%arg0: i32) -> (i32, i32) {
    %c0_i32 = arith.constant 0 : i32
    %c0_i32_0 = arith.constant 0 : i32
    %c0_i32_1 = arith.constant 0 : i32
    return %c0_i32, %c0_i32_0 : i32, i32
  }
  func.func @transform_6(%arg0: i32) -> (i32, i32) {
    %c0_i32 = arith.constant 0 : i32
    %c0_i32_0 = arith.constant 0 : i32
    return %arg0, %c0_i32 : i32, i32
  }
}

</mosaic_0001>

<bundles_post_ra>
// kernel: deconv_bn_forward.2
= control target key start
LH: loop header
LB: loop body
LE: loop exit
PB: predicated region body
PF: predicated region fallthrough
CT: control target
= control target key end

     0   :  { %s1329_s12 = smov 0   ;;  %s1331_s13 = smov 0   ;;  %s1621_s0 = inlined_call_operand.vmem [shape: bf16[2048,128], index: 0, kind: input, shape index: {}]   ;;  %s1622_s1 = inlined_call_operand.vmem [shape: bf16[128,128], index: 1, kind: input, shape index: {}]   ;;  %s1623_s2 = inlined_call_operand.vmem [shape: f32[2,1,128], index: 2, kind: output, shape index: {0}]   ;;  %s1624_s3 = inlined_call_operand.vmem [shape: f32[2,1,128], index: 3, kind: output, shape index: {1}]  }
   0x1   :  { %s1333_s14 = smov 0   ;;  %s1335_s15 = smov 0  }
   0x2   :  { %s1337_s16 = smov 0  }
   0x3 LB: > { %s23_s17 = sadd.s32 1, %s1298_s14  ;;  %s26_s18 = sadd.s32 1, %s1302_s15  ;;  %s1306_s16 = sphi %s1337_s16, %s14_s16   ;;  %s1302_s15 = sphi %s1335_s15, %s1628_s15   ;;  %s1298_s14 = sphi %s1333_s14, %s1627_s14   ;;  %s1294_s13 = sphi %s1331_s13, %s1626_s13   ;;  %s1290_s12 = sphi %s1329_s12, %s1625_s12  }
   0x4   : > { %p24_p0 = scmp.ge.s32.totalorder %s23_s17, 2  ;;  %p996_p1 = scmp.ge.s32.totalorder %s1306_s16, 1 }
   0x5   : > { %p161_p2 = scmp.lt.s32.totalorder %s1306_s16, 5 }
   0x6   : > { %s1630_s17 = smov (%p24_p0, %s23_s17), 0  ;;  %s1632_s18 = smov (!%p24_p0, %s26_s18), %s1302_s15 }
   0x7   : > { %p162_p3 = pnand %p996_p1, %p161_p2  ;;  %p28_p4 = scmp.ge.s32.totalorder %s1632_s18, 2 }
   0x8   : > { %s997_s19 = sshll.u32 (!%p162_p3), %s1294_s13, 1  ;;  %p198_p5 = scmp.lt.s32.totalorder (!%p162_p3), %s1294_s13, 1 }
   0x9   : > { %s1634_s18 = smov (%p28_p4, %s1632_s18), 0  ;;  %165 = sbr.rel (%p162_p3) target bundleno = 417 (0x1a1), region = 28 }
   0xa   : > { %s189_s20 = sadd.s32 (!%p162_p3), %s1290_s12, %s997_s19  ;;  %p1000_p7 = scmp.ne.s32.totalorder (!%p162_p3), %s1290_s12, 0 }
   0xb   : > { %s998_s21 = sshll.u32 (!%p162_p3), %s189_s20, 6 }
   0xc   : > { %p191_p6 = scmp.lt.s32.totalorder (!%p162_p3), %s998_s21, 255 }
   0xe   : > { %s1636_s13 = smov (!%p198_p5, %s1294_s13), 1  ;;  %s1638_s21 = smov (!%p191_p6, %s998_s21), 255 }
   0xf   : > { %s1362_s24 = scalar_lea.vmem %s1623_s2, %s1636_s13  ;;  %s1367_s27 = scalar_lea.vmem %s1624_s3, %s1636_s13 }
  0x10   : > { %s999_s28 = sshll.u32 %s1638_s21, 2  ;;  %207 = sbr.rel (%p1000_p7) target bundleno = 24 (0x18), region = 32 }
  0x11   : > { %s1372_s4 = scalar_lea.vmem %s1621_s0, %s999_s28 }
  0x15   : > { %v1308_v0 = vmov 0.0  }
  0x16   : > { %208 = vst [vmem:[%s1362_s24] sm:$0x1] %v1308_v0 }
  0x17   : > { %209 = vst [vmem:[%s1367_s27] sm:$0x1] %v1308_v0 }
  0x18 PF: > { %v1202_v1 = vld [vmem:[%s1622_s1 + $0x38] sm:$0xff]  ;;  %v1201_v2 = vld [vmem:[%s1622_s1 + $0x30] sm:$0xff]  ;;  %v1200_v3 = vld [vmem:[%s1622_s1 + $0x28] sm:$0xff] }
  0x19   : > { %530 = vmatpush.bf16.msra.mxu0 %v1202_v1  ;;  %1203 = vmatpush.bf16.msra.mxu1 %v1202_v1  ;;  %v1199_v4 = vld [vmem:[%s1622_s1 + $0x20] sm:$0xff]  ;;  %v1198_v5 = vld [vmem:[%s1622_s1 + $0x18] sm:$0xff]  ;;  %v1197_v6 = vld [vmem:[%s1622_s1 + $0x10] sm:$0xff] }
  0x1a   : > { %1204 = vmatpush.bf16.msra.mxu2 %v1202_v1  ;;  %1205 = vmatpush.bf16.msra.mxu3 %v1202_v1  ;;  %v1196_v7 = vld [vmem:[%s1622_s1 + $0x8] sm:$0xff]  ;;  %v1195_v8 = vld [vmem:[%s1622_s1] sm:$0xff]  ;;  %v1165_v14 = vld [vmem:[%s1372_s4 + $0x10] sm:$0xff] }
  0x1b   : > { %v1163_v9 = vld [vmem:[%s1372_s4] sm:$0xff]  ;;  %v1164_v11 = vld [vmem:[%s1372_s4 + $0x8] sm:$0xff]  ;;  %v1173_v15 = vld [vmem:[%s1372_s4 + $0x50] sm:$0xff] }
  0x1c   : > { %v1171_v10 = vld [vmem:[%s1372_s4 + $0x40] sm:$0xff]  ;;  %v1172_v12 = vld [vmem:[%s1372_s4 + $0x48] sm:$0xff]  ;;  %v1166_v17 = vld [vmem:[%s1372_s4 + $0x18] sm:$0xff] }
  0x1d   : > { %531 = vmatpush.bf16.msra.mxu0 %v1201_v2  ;;  %1206 = vmatpush.bf16.msra.mxu1 %v1201_v2  ;;  %v1179_v13 = vld [vmem:[%s1372_s4 + $0x80] sm:$0xff]  ;;  %v1180_v16 = vld [vmem:[%s1372_s4 + $0x88] sm:$0xff]  ;;  %v1174_v18 = vld [vmem:[%s1372_s4 + $0x58] sm:$0xff] }
  0x1e   : > { %1207 = vmatpush.bf16.msra.mxu2 %v1201_v2  ;;  %1208 = vmatpush.bf16.msra.mxu3 %v1201_v2  ;;  %v1181_v19 = vld [vmem:[%s1372_s4 + $0x90] sm:$0xff]  ;;  %v1187_v20 = vld [vmem:[%s1372_s4 + $0xc0] sm:$0xff]  ;;  %v1182_v23 = vld [vmem:[%s1372_s4 + $0x98] sm:$0xff] }
  0x1f   : > { %v1167_v21 = vld [vmem:[%s1372_s4 + $0x20] sm:$0xff]  ;;  %v1188_v24 = vld [vmem:[%s1372_s4 + $0xc8] sm:$0xff]  ;;  %v1189_v28 = vld [vmem:[%s1372_s4 + $0xd0] sm:$0xff] }
  0x20   : > { %v1175_v22 = vld [vmem:[%s1372_s4 + $0x60] sm:$0xff]  ;;  %v1168_v25 = vld [vmem:[%s1372_s4 + $0x28] sm:$0xff]  ;;  %v1169_v29 = vld [vmem:[%s1372_s4 + $0x30] sm:$0xff] }
  0x21   : > { %532 = vmatpush.bf16.msra.mxu0 %v1200_v3  ;;  %1209 = vmatpush.bf16.msra.mxu1 %v1200_v3  ;;  %v1176_v26 = vld [vmem:[%s1372_s4 + $0x68] sm:$0xff]  ;;  %v1183_v27 = vld [vmem:[%s1372_s4 + $0xa0] sm:$0xff]  ;;  %v1177_v30 = vld [vmem:[%s1372_s4 + $0x70] sm:$0xff] }
  0x22   : > { %1210 = vmatpush.bf16.msra.mxu2 %v1200_v3  ;;  %1211 = vmatpush.bf16.msra.mxu3 %v1200_v3  ;;  %v1184_v31 = vld [vmem:[%s1372_s4 + $0xa8] sm:$0xff]  ;;  %v1190_v32 = vld [vmem:[%s1372_s4 + $0xd8] sm:$0xff]  ;;  %v1185_v35 = vld [vmem:[%s1372_s4 + $0xb0] sm:$0xff] }
  0x23   : > { %v1170_v33 = vld [vmem:[%s1372_s4 + $0x38] sm:$0xff]  ;;  %v1191_v36 = vld [vmem:[%s1372_s4 + $0xe0] sm:$0xff]  ;;  %v1192_v40 = vld [vmem:[%s1372_s4 + $0xe8] sm:$0xff] }
  0x24   : > { %v1178_v34 = vld [vmem:[%s1372_s4 + $0x78] sm:$0xff]  ;;  %v1193_v51 = vld [vmem:[%s1372_s4 + $0xf0] sm:$0xff] }
  0x25   : > { %533 = vmatpush.bf16.msra.mxu0 %v1199_v4  ;;  %1212 = vmatpush.bf16.msra.mxu1 %v1199_v4  ;;  %v1186_v39 = vld [vmem:[%s1372_s4 + $0xb8] sm:$0xff] }
  0x26   : > { %1213 = vmatpush.bf16.msra.mxu2 %v1199_v4  ;;  %1214 = vmatpush.bf16.msra.mxu3 %v1199_v4  ;;  %v1194_v63 = vld [vmem:[%s1372_s4 + $0xf8] sm:$0xff] }
  0x29   : > { %534 = vmatpush.bf16.msra.mxu0 %v1198_v5  ;;  %1215 = vmatpush.bf16.msra.mxu1 %v1198_v5 }
  0x2a   : > { %1216 = vmatpush.bf16.msra.mxu2 %v1198_v5  ;;  %1217 = vmatpush.bf16.msra.mxu3 %v1198_v5 }
  0x2d   : > { %535 = vmatpush.bf16.msra.mxu0 %v1197_v6  ;;  %1218 = vmatpush.bf16.msra.mxu1 %v1197_v6 }
  0x2e   : > { %1219 = vmatpush.bf16.msra.mxu2 %v1197_v6  ;;  %1220 = vmatpush.bf16.msra.mxu3 %v1197_v6 }
  0x31   : > { %536 = vmatpush.bf16.msra.mxu0 %v1196_v7  ;;  %1221 = vmatpush.bf16.msra.mxu1 %v1196_v7 }
  0x32   : > { %1222 = vmatpush.bf16.msra.mxu2 %v1196_v7  ;;  %1223 = vmatpush.bf16.msra.mxu3 %v1196_v7 }
  0x35   : > { %537 = vmatpush.bf16.msra.mxu0 %v1195_v8  ;;  %1224 = vmatpush.bf16.msra.mxu1 %v1195_v8 }
  0x36   : > { %1225 = vmatpush.bf16.msra.mxu2 %v1195_v8  ;;  %1226 = vmatpush.bf16.msra.mxu3 %v1195_v8 }
  0x38   : > { %538 = vmatmul.bf16.vlgmr.msra.gmra.mxu0 %v1163_v9  ;;  %578 = vmatmul.bf16.vlgmr.msra.gmra.mxu1 %v1171_v10 }
  0x39   : > { %618 = vmatmul.bf16.vlgmr.msra.gmra.mxu2 %v1179_v13  ;;  %658 = vmatmul.bf16.vlgmr.msra.gmra.mxu3 %v1187_v20 }
  0x48   : > { %543 = vmatmul.bf16.gmra.mxu0 %v1164_v11  ;;  %583 = vmatmul.bf16.gmra.mxu1 %v1172_v12 }
  0x49   : > { %623 = vmatmul.bf16.gmra.mxu2 %v1180_v16  ;;  %663 = vmatmul.bf16.gmra.mxu3 %v1188_v24 }
  0x58   : > { %548 = vmatmul.bf16.gmra.mxu0 %v1165_v14  ;;  %588 = vmatmul.bf16.gmra.mxu1 %v1173_v15 }
  0x59   : > { %628 = vmatmul.bf16.gmra.mxu2 %v1181_v19  ;;  %668 = vmatmul.bf16.gmra.mxu3 %v1189_v28 }
  0x68   : > { %553 = vmatmul.bf16.gmra.mxu0 %v1166_v17  ;;  %593 = vmatmul.bf16.gmra.mxu1 %v1174_v18 }
  0x69   : > { %633 = vmatmul.bf16.gmra.mxu2 %v1182_v23  ;;  %673 = vmatmul.bf16.gmra.mxu3 %v1190_v32 }
  0x78   : > { %558 = vmatmul.bf16.gmra.mxu0 %v1167_v21  ;;  %598 = vmatmul.bf16.gmra.mxu1 %v1175_v22 }
  0x79   : > { %638 = vmatmul.bf16.gmra.mxu2 %v1183_v27  ;;  %678 = vmatmul.bf16.gmra.mxu3 %v1191_v36 }
  0x88   : > { %563 = vmatmul.bf16.gmra.mxu0 %v1168_v25  ;;  %603 = vmatmul.bf16.gmra.mxu1 %v1176_v26 }
  0x89   : > { %643 = vmatmul.bf16.gmra.mxu2 %v1184_v31  ;;  %683 = vmatmul.bf16.gmra.mxu3 %v1192_v40 }
  0x98   : > { %568 = vmatmul.bf16.gmra.mxu0 %v1169_v29  ;;  %608 = vmatmul.bf16.gmra.mxu1 %v1177_v30 }
  0x99   : > { %648 = vmatmul.bf16.gmra.mxu2 %v1185_v35  ;;  %688 = vmatmul.bf16.gmra.mxu3 %v1193_v51 }
  0xa8   : > { %573 = vmatmul.bf16.gmra.mxu0 %v1170_v33  ;;  %613 = vmatmul.bf16.gmra.mxu1 %v1178_v34 }
  0xa9   : > { %653 = vmatmul.bf16.gmra.mxu2 %v1186_v39  ;;  %693 = vmatmul.bf16.gmra.mxu3 %v1194_v63 }
  0xb5   : > { %v539_v37 = vpop.f32.mrf.mxu0  ;;  %v1428_v38 = vpop.f32.mrf.mxu1 }
  0xb6   : > { %v772_v42 = vmul.f32 %v539_v37, %v539_v37 }
  0xbc   : > { %v1439_v59 = vpop.f32.mrf.mxu2  ;;  %v1454_v10 = vpop.f32.mrf.mxu3 }
  0xbd   : > { %v541_v41 = vpop.f32.mrf.mxu0  ;;  %v1432_v45 = vpop.f32.mrf.mxu1 }
  0xbe   : > { %v700_v43 = vadd.f32 %v541_v41, %v539_v37  ;;  %v773_v44 = vmul.f32 %v541_v41, %v541_v41 }
  0xc0   : > { %v836_v46 = vadd.f32 %v773_v44, %v772_v42 }
  0xc4   : > { %v1444_v2 = vpop.f32.mrf.mxu2  ;;  %v1460_v14 = vpop.f32.mrf.mxu3 }
  0xc5   : > { %v544_v47 = vpop.f32.mrf.mxu0  ;;  %v1435_v52 = vpop.f32.mrf.mxu1 }
  0xc6   : > { %v701_v48 = vadd.f32 %v700_v43, %v544_v47  ;;  %v774_v49 = vmul.f32 %v544_v47, %v544_v47 }
  0xc8   : > { %v837_v50 = vadd.f32 %v836_v46, %v774_v49 }
  0xcc   : > { %v1448_v5 = vpop.f32.mrf.mxu2  ;;  %v1466_v18 = vpop.f32.mrf.mxu3 }
  0xcd   : > { %v546_v53 = vpop.f32.mrf.mxu0  ;;  %v1437_v57 = vpop.f32.mrf.mxu1 }
  0xce   : > { %v702_v54 = vadd.f32 %v701_v48, %v546_v53  ;;  %v775_v55 = vmul.f32 %v546_v53, %v546_v53 }
  0xd0   : > { %v838_v56 = vadd.f32 %v837_v50, %v775_v55 }
  0xd4   : > { %v1452_v8 = vpop.f32.mrf.mxu2  ;;  %v1472_v22 = vpop.f32.mrf.mxu3 }
  0xd5   : > { %v549_v58 = vpop.f32.mrf.mxu0  ;;  %v1442_v1 = vpop.f32.mrf.mxu1 }
  0xd6   : > { %v703_v60 = vadd.f32 %v702_v54, %v549_v58  ;;  %v776_v61 = vmul.f32 %v549_v58, %v549_v58 }
  0xd8   : > { %v839_v62 = vadd.f32 %v838_v56, %v776_v61 }
  0xdc   : > { %v1458_v13 = vpop.f32.mrf.mxu2  ;;  %v1478_v33 = vpop.f32.mrf.mxu3 }
  0xdd   : > { %v551_v0 = vpop.f32.mrf.mxu0  ;;  %v1446_v4 = vpop.f32.mrf.mxu1 }
  0xde   : > { %v777_v24 = vmul.f32 %v551_v0, %v551_v0  ;;  %v704_v26 = vadd.f32 %v703_v60, %v551_v0 }
  0xe0   : > { %v840_v29 = vadd.f32 %v839_v62, %v777_v24 }
  0xe4   : > { %v1464_v17 = vpop.f32.mrf.mxu2  ;;  %v1484_v55 = vpop.f32.mrf.mxu3 }
  0xe5   : > { %v554_v3 = vpop.f32.mrf.mxu0  ;;  %v1450_v7 = vpop.f32.mrf.mxu1 }
  0xe6   : > { %v778_v27 = vmul.f32 %v554_v3, %v554_v3  ;;  %v705_v30 = vadd.f32 %v704_v26, %v554_v3 }
  0xe8   : > { %v841_v34 = vadd.f32 %v840_v29, %v778_v27 }
  0xec   : > { %v1470_v21 = vpop.f32.mrf.mxu2 }
  0xed   : > { %v556_v6 = vpop.f32.mrf.mxu0  ;;  %v1456_v11 = vpop.f32.mrf.mxu1 }
  0xee   : > { %v779_v31 = vmul.f32 %v556_v6, %v556_v6  ;;  %v706_v35 = vadd.f32 %v705_v30, %v556_v6  ;;  %v789_v30 = vmul.f32 %v1432_v45, %v1432_v45 }
  0xf0   : > { %v842_v37 = vadd.f32 %v841_v34, %v779_v31  ;;  %v790_v34 = vmul.f32 %v1435_v52, %v1435_v52 }
  0xf4   : > { %v1476_v28 = vpop.f32.mrf.mxu2 }
  0xf5   : > { %v559_v9 = vpop.f32.mrf.mxu0  ;;  %v1462_v16 = vpop.f32.mrf.mxu1 }
  0xf6   : > { %v780_v36 = vmul.f32 %v559_v9, %v559_v9  ;;  %v707_v39 = vadd.f32 %v706_v35, %v559_v9 }
  0xf8   : > { %v843_v41 = vadd.f32 %v842_v37, %v780_v36  ;;  %v791_v37 = vmul.f32 %v1437_v57, %v1437_v57 }
  0xfc   : > { %v1482_v50 = vpop.f32.mrf.mxu2 }
  0xfd   : > { %v561_v12 = vpop.f32.mrf.mxu0  ;;  %v1468_v20 = vpop.f32.mrf.mxu1 }
  0xfe   : > { %v781_v40 = vmul.f32 %v561_v12, %v561_v12  ;;  %v708_v42 = vadd.f32 %v707_v39, %v561_v12 }
 0x100   : > { %v844_v46 = vadd.f32 %v843_v41, %v781_v40  ;;  %v792_v41 = vmul.f32 %v1442_v1, %v1442_v1 }
 0x104   : > { %v1486_v26 = vpop.f32.mrf.mxu2 }
 0x105   : > { %v564_v15 = vpop.f32.mrf.mxu0  ;;  %v1474_v25 = vpop.f32.mrf.mxu1 }
 0x106   : > { %v782_v43 = vmul.f32 %v564_v15, %v564_v15  ;;  %v709_v47 = vadd.f32 %v708_v42, %v564_v15 }
 0x108   : > { %v845_v51 = vadd.f32 %v844_v46, %v782_v43  ;;  %v793_v46 = vmul.f32 %v1446_v4, %v1446_v4 }
 0x10c   : > { %v1505_v43 = vpop.f32.mrf.mxu2 }
 0x10d   : > { %v566_v19 = vpop.f32.mrf.mxu0  ;;  %v1480_v44 = vpop.f32.mrf.mxu1 }
 0x10e   : > { %v783_v48 = vmul.f32 %v566_v19, %v566_v19  ;;  %v710_v53 = vadd.f32 %v709_v47, %v566_v19  ;;  %v788_v19 = vmul.f32 %v1428_v38, %v1428_v38 }
 0x110   : > { %v846_v56 = vadd.f32 %v845_v51, %v783_v48 }
 0x115   : > { %v569_v23 = vpop.f32.mrf.mxu0  ;;  %v609_v9 = vpop.f32.mrf.mxu1 }
 0x116   : > { %v784_v54 = vmul.f32 %v569_v23, %v569_v23  ;;  %v711_v58 = vadd.f32 %v710_v53, %v569_v23  ;;  %v1491_v23 = vpop.f32.mrf.mxu3 }
 0x118   : > { %v847_v61 = vadd.f32 %v846_v56, %v784_v54  ;;  %v796_v56 = vmul.f32 %v1462_v16, %v1462_v16 }
 0x11d   : > { %v571_v32 = vpop.f32.mrf.mxu0  ;;  %v611_v40 = vpop.f32.mrf.mxu1 }
 0x11e   : > { %v785_v60 = vmul.f32 %v571_v32, %v571_v32  ;;  %v712_v62 = vadd.f32 %v711_v58, %v571_v32  ;;  %v1510_v48 = vpop.f32.mrf.mxu3 }
 0x120   : > { %v848_v0 = vadd.f32 %v847_v61, %v785_v60  ;;  %v797_v61 = vmul.f32 %v1468_v20, %v1468_v20 }
 0x125   : > { %v574_v49 = vpop.f32.mrf.mxu0  ;;  %v614_v60 = vpop.f32.mrf.mxu1 }
 0x126   : > { %v786_v63 = vmul.f32 %v574_v49, %v574_v49  ;;  %v713_v3 = vadd.f32 %v712_v62, %v574_v49 }
 0x128   : > { %v849_v12 = vadd.f32 %v848_v0, %v786_v63  ;;  %v798_v0 = vmul.f32 %v1474_v25, %v1474_v25 }
 0x12d   : > { %v576_v6 = vpop.f32.mrf.mxu0 }
 0x12e   : > { %v714_v15 = vadd.f32 %v713_v3, %v576_v6  ;;  %v787_v24 = vmul.f32 %v576_v6, %v576_v6  ;;  %v1527_v6 = vpop.f32.mrf.mxu3 }
 0x130   : > { %v715_v27 = vadd.f32 %v714_v15, %v1428_v38  ;;  %v850_v29 = vadd.f32 %v849_v12, %v787_v24 }
 0x132   : > { %v716_v31 = vadd.f32 %v715_v27, %v1432_v45  ;;  %v851_v32 = vadd.f32 %v850_v29, %v788_v19  ;;  %v800_v19 = vmul.f32 %v609_v9, %v609_v9 }
 0x134   : > { %v717_v35 = vadd.f32 %v716_v31, %v1435_v52  ;;  %v852_v36 = vadd.f32 %v851_v32, %v789_v30  ;;  %v801_v30 = vmul.f32 %v611_v40, %v611_v40  ;;  %v616_v31 = vpop.f32.mrf.mxu1 }
 0x136   : > { %v718_v38 = vadd.f32 %v717_v35, %v1437_v57  ;;  %v853_v39 = vadd.f32 %v852_v36, %v790_v34  ;;  %v794_v57 = vmul.f32 %v1450_v7, %v1450_v7  ;;  %v802_v35 = vmul.f32 %v614_v60, %v614_v60 }
 0x138   : > { %v719_v42 = vadd.f32 %v718_v38, %v1442_v1  ;;  %v854_v45 = vadd.f32 %v853_v39, %v791_v37  ;;  %v795_v1 = vmul.f32 %v1456_v11, %v1456_v11  ;;  %v803_v38 = vmul.f32 %v616_v31, %v616_v31  ;;  %v1532_v39 = vpop.f32.mrf.mxu3 }
 0x13a   : > { %v720_v52 = vadd.f32 %v719_v42, %v1446_v4  ;;  %v855_v47 = vadd.f32 %v854_v45, %v792_v41  ;;  %v805_v42 = vmul.f32 %v1444_v2, %v1444_v2 }
 0x13c   : > { %v856_v49 = vadd.f32 %v855_v47, %v793_v46  ;;  %v721_v51 = vadd.f32 %v720_v52, %v1450_v7  ;;  %v646_v7 = vpop.f32.mrf.mxu2  ;;  %v806_v46 = vmul.f32 %v1448_v5, %v1448_v5 }
 0x13e   : > { %v722_v53 = vadd.f32 %v721_v51, %v1456_v11  ;;  %v857_v54 = vadd.f32 %v856_v49, %v794_v57  ;;  %v807_v57 = vmul.f32 %v1452_v8, %v1452_v8 }
 0x140   : > { %v723_v4 = vadd.f32 %v722_v53, %v1462_v16  ;;  %v858_v58 = vadd.f32 %v857_v54, %v795_v1  ;;  %v799_v16 = vmul.f32 %v1480_v44, %v1480_v44  ;;  %v808_v1 = vmul.f32 %v1458_v13, %v1458_v13  ;;  %v1549_v54 = vpop.f32.mrf.mxu3 }
 0x142   : > { %v724_v62 = vadd.f32 %v723_v4, %v1468_v20  ;;  %v859_v63 = vadd.f32 %v858_v58, %v796_v56  ;;  %v809_v56 = vmul.f32 %v1464_v17, %v1464_v17  ;;  %v810_v58 = vmul.f32 %v1470_v21, %v1470_v21 }
 0x144   : > { %v725_v11 = vadd.f32 %v724_v62, %v1474_v25  ;;  %v860_v3 = vadd.f32 %v859_v63, %v797_v61  ;;  %v649_v25 = vpop.f32.mrf.mxu2  ;;  %v811_v61 = vmul.f32 %v1476_v28, %v1476_v28  ;;  %v812_v63 = vmul.f32 %v1482_v50, %v1482_v50 }
 0x146   : > { %v726_v12 = vadd.f32 %v725_v11, %v1480_v44  ;;  %v861_v15 = vadd.f32 %v860_v3, %v798_v0  ;;  %v804_v44 = vmul.f32 %v1439_v59, %v1439_v59  ;;  %v813_v3 = vmul.f32 %v1486_v26, %v1486_v26 }
 0x148   : > { %v727_v24 = vadd.f32 %v726_v12, %v609_v9  ;;  %v862_v27 = vadd.f32 %v861_v15, %v799_v16  ;;  %v814_v15 = vmul.f32 %v1505_v43, %v1505_v43 }
 0x14a   : > { %v863_v20 = vadd.f32 %v862_v27, %v800_v19  ;;  %v728_v29 = vadd.f32 %v727_v24, %v611_v40  ;;  %v815_v27 = vmul.f32 %v646_v7, %v646_v7 }
 0x14c   : > { %v864_v32 = vadd.f32 %v863_v20, %v801_v30  ;;  %v729_v34 = vadd.f32 %v728_v29, %v614_v60  ;;  %v816_v30 = vmul.f32 %v649_v25, %v649_v25 }
 0x14e   : > { %v865_v36 = vadd.f32 %v864_v32, %v802_v35  ;;  %v730_v37 = vadd.f32 %v729_v34, %v616_v31 }
 0x150   : > { %v731_v41 = vadd.f32 %v730_v37, %v1439_v59  ;;  %v866_v9 = vadd.f32 %v865_v36, %v803_v38  ;;  %v651_v59 = vpop.f32.mrf.mxu2 }
 0x151   : > { %v817_v34 = vmul.f32 %v651_v59, %v651_v59 }
 0x152   : > { %v732_v40 = vadd.f32 %v731_v41, %v1444_v2  ;;  %v867_v45 = vadd.f32 %v866_v9, %v804_v44 }
 0x154   : > { %v733_v52 = vadd.f32 %v732_v40, %v1448_v5  ;;  %v868_v47 = vadd.f32 %v867_v45, %v805_v42 }
 0x156   : > { %v734_v49 = vadd.f32 %v733_v52, %v1452_v8  ;;  %v869_v51 = vadd.f32 %v868_v47, %v806_v46  ;;  %v822_v46 = vmul.f32 %v1466_v18, %v1466_v18 }
 0x158   : > { %v735_v53 = vadd.f32 %v734_v49, %v1458_v13  ;;  %v870_v2 = vadd.f32 %v869_v51, %v807_v57  ;;  %v823_v57 = vmul.f32 %v1472_v22, %v1472_v22 }
 0x15a   : > { %v736_v5 = vadd.f32 %v735_v53, %v1464_v17  ;;  %v871_v4 = vadd.f32 %v870_v2, %v808_v1  ;;  %v654_v17 = vpop.f32.mrf.mxu2  ;;  %v825_v53 = vmul.f32 %v1484_v55, %v1484_v55 }
 0x15b   : > { %v818_v37 = vmul.f32 %v654_v17, %v654_v17 }
 0x15c   : > { %v872_v8 = vadd.f32 %v871_v4, %v809_v56  ;;  %v737_v60 = vadd.f32 %v736_v5, %v1470_v21  ;;  %v686_v21 = vpop.f32.mrf.mxu3  ;;  %v826_v56 = vmul.f32 %v1491_v23, %v1491_v23  ;;  %v827_v4 = vmul.f32 %v1510_v48, %v1510_v48 }
 0x15e   : > { %v738_v13 = vadd.f32 %v737_v60, %v1476_v28  ;;  %v873_v62 = vadd.f32 %v872_v8, %v810_v58 }
 0x160   : > { %v739_v0 = vadd.f32 %v738_v13, %v1482_v50  ;;  %v874_v11 = vadd.f32 %v873_v62, %v811_v61  ;;  %v829_v13 = vmul.f32 %v1532_v39, %v1532_v39 }
 0x162   : > { %v740_v16 = vadd.f32 %v739_v0, %v1486_v26  ;;  %v875_v12 = vadd.f32 %v874_v11, %v812_v63  ;;  %v656_v35 = vpop.f32.mrf.mxu2 }
 0x163   : > { %v819_v9 = vmul.f32 %v656_v35, %v656_v35 }
 0x164   : > { %v741_v28 = vadd.f32 %v740_v16, %v1505_v43  ;;  %v876_v24 = vadd.f32 %v875_v12, %v813_v3  ;;  %v689_v38 = vpop.f32.mrf.mxu3  ;;  %v820_v43 = vmul.f32 %v1454_v10, %v1454_v10 }
 0x166   : > { %v742_v19 = vadd.f32 %v741_v28, %v646_v7  ;;  %v877_v20 = vadd.f32 %v876_v24, %v814_v15 }
 0x168   : > { %v878_v29 = vadd.f32 %v877_v20, %v815_v27  ;;  %v743_v50 = vadd.f32 %v742_v19, %v649_v25  ;;  %v821_v25 = vmul.f32 %v1460_v14, %v1460_v14 }
 0x16a   : > { %v879_v31 = vadd.f32 %v878_v29, %v816_v30  ;;  %v744_v32 = vadd.f32 %v743_v50, %v651_v59  ;;  %v824_v59 = vmul.f32 %v1478_v33, %v1478_v33 }
 0x16c   : > { %v880_v36 = vadd.f32 %v879_v31, %v817_v34  ;;  %v745_v26 = vadd.f32 %v744_v32, %v654_v17  ;;  %v831_v17 = vmul.f32 %v686_v21, %v686_v21 }
 0x16e   : > { %v881_v44 = vadd.f32 %v880_v36, %v818_v37  ;;  %v746_v41 = vadd.f32 %v745_v26, %v656_v35 }
 0x170   : > { %v747_v7 = vadd.f32 %v746_v41, %v1454_v10  ;;  %v882_v42 = vadd.f32 %v881_v44, %v819_v9  ;;  %v691_v10 = vpop.f32.mrf.mxu3  ;;  %v699_v44 = vld [vmem:[%s1362_s24] sm:$0x1] }
 0x171   : > { %v833_v24 = vmul.f32 %v691_v10, %v691_v10 }
 0x172   : > { %v748_v40 = vadd.f32 %v747_v7, %v1460_v14  ;;  %v883_v45 = vadd.f32 %v882_v42, %v820_v43  ;;  %v771_v43 = vld [vmem:[%s1367_s27] sm:$0x1] }
 0x174   : > { %v749_v52 = vadd.f32 %v748_v40, %v1466_v18  ;;  %v884_v47 = vadd.f32 %v883_v45, %v821_v25 }
 0x176   : > { %v750_v49 = vadd.f32 %v749_v52, %v1472_v22  ;;  %v885_v51 = vadd.f32 %v884_v47, %v822_v46 }
 0x178   : > { %v751_v1 = vadd.f32 %v750_v49, %v1478_v33  ;;  %v886_v14 = vadd.f32 %v885_v51, %v823_v57  ;;  %v828_v33 = vmul.f32 %v1527_v6, %v1527_v6 }
 0x17a   : > { %v752_v2 = vadd.f32 %v751_v1, %v1484_v55  ;;  %v887_v18 = vadd.f32 %v886_v14, %v824_v59  ;;  %v694_v55 = vpop.f32.mrf.mxu3 }
 0x17b   : > { %v834_v20 = vmul.f32 %v694_v55, %v694_v55 }
 0x17c   : > { %v888_v5 = vadd.f32 %v887_v18, %v825_v53  ;;  %v753_v22 = vadd.f32 %v752_v2, %v1491_v23  ;;  %v830_v23 = vmul.f32 %v1549_v54, %v1549_v54 }
 0x17e   : > { %v754_v58 = vadd.f32 %v753_v22, %v1510_v48  ;;  %v889_v8 = vadd.f32 %v888_v5, %v826_v56 }
 0x180   : > { %v755_v60 = vadd.f32 %v754_v58, %v1527_v6  ;;  %v890_v61 = vadd.f32 %v889_v8, %v827_v4  ;;  %v832_v6 = vmul.f32 %v689_v38, %v689_v38 }
 0x182   : > { %v756_v62 = vadd.f32 %v755_v60, %v1532_v39  ;;  %v891_v63 = vadd.f32 %v890_v61, %v828_v33  ;;  %v696_v19 = vpop.f32.mrf.mxu3 }
 0x183   : > { %v835_v30 = vmul.f32 %v696_v19, %v696_v19 }
 0x184   : > { %v757_v0 = vadd.f32 %v756_v62, %v1549_v54  ;;  %v892_v48 = vadd.f32 %v891_v63, %v829_v13 }
 0x186   : > { %v758_v11 = vadd.f32 %v757_v0, %v686_v21  ;;  %v893_v3 = vadd.f32 %v892_v48, %v830_v23 }
 0x188   : > { %v894_v16 = vadd.f32 %v893_v3, %v831_v17  ;;  %v759_v12 = vadd.f32 %v758_v11, %v689_v38 }
 0x18a   : > { %v895_v15 = vadd.f32 %v894_v16, %v832_v6  ;;  %v760_v28 = vadd.f32 %v759_v12, %v691_v10 }
 0x18c   : > { %v896_v27 = vadd.f32 %v895_v15, %v833_v24  ;;  %v761_v39 = vadd.f32 %v760_v28, %v694_v55 }
 0x18e   : > { %v897_v29 = vadd.f32 %v896_v27, %v834_v20  ;;  %v762_v50 = vadd.f32 %v761_v39, %v696_v19 }
 0x190   : > { %v763_v54 = vrot.slane %v762_v50, 4  ;;  %v898_v31 = vadd.f32 %v897_v29, %v835_v30 }
 0x192   : > { %v764_v21 = vadd.f32 %v763_v54, %v762_v50  ;;  %v899_v32 = vrot.slane %v898_v31, 4 }
 0x194   : > { %v765_v34 = vrot.slane %v764_v21, 2  ;;  %v900_v35 = vadd.f32 %v899_v32, %v898_v31 }
 0x196   : > { %v766_v36 = vadd.f32 %v765_v34, %v764_v21  ;;  %v901_v26 = vrot.slane %v900_v35, 2 }
 0x198   : > { %v767_v37 = vrot.slane %v766_v36, 1  ;;  %v902_v38 = vadd.f32 %v901_v26, %v900_v35 }
 0x19a   : > { %v768_v41 = vadd.f32 %v767_v37, %v766_v36  ;;  %v903_v9 = vrot.slane %v902_v38, 1 }
 0x19c   : > { %v769_v7 = vadd.f32 %v768_v41, %v699_v44  ;;  %v904_v42 = vadd.f32 %v903_v9, %v902_v38 }
 0x19e   : > { %770 = vst [vmem:[%s1362_s24] sm:$0x1] %v769_v7  ;;  %v905_v25 = vadd.f32 %v904_v42, %v771_v43 }
 0x1a0   : > { %906 = vst [vmem:[%s1367_s27] sm:$0x1] %v905_v25 }
 0x1a1 PF: > { %s14_s16 = sadd.s32 1, %s1306_s16   ;;  %s1625_s12 = smov %s1298_s14 }
 0x1a2   : > { %p11_p8 = scmp.ge.s32.totalorder %s14_s16, 6   ;;  %s1626_s13 = smov %s1302_s15 }
 0x1a3   : > { %s1627_s14 = smov %s1630_s17  ;;  %s1628_s15 = smov %s1634_s18 }
 0x1a4   :  { %13 = sbr.rel (!%p11_p8) target bundleno = 3 (0x3), region = 74 }

// kernel: deconv_bn_forward.3
= control target key start
LH: loop header
LB: loop body
LE: loop exit
PB: predicated region body
PF: predicated region fallthrough
CT: control target
= control target key end

     0   :  { %s2077_s21 = smov 0   ;;  %s2590_s0 = inlined_call_operand.vmem [shape: bf16[2048,128], index: 0, kind: input, shape index: {}]   ;;  %s2591_s1 = inlined_call_operand.vmem [shape: bf16[128,128], index: 1, kind: input, shape index: {}]   ;;  %s2592_s2 = inlined_call_operand.vmem [shape: f32[1,128], index: 2, kind: input, shape index: {}]   ;;  %s2593_s3 = inlined_call_operand.vmem [shape: f32[1,128], index: 3, kind: input, shape index: {}]   ;;  %s2594_s4 = inlined_call_operand.vmem [shape: f32[1,128], index: 4, kind: input, shape index: {}]   ;;  %s2595_s5 = inlined_call_operand.vmem [shape: f32[1,128], index: 5, kind: input, shape index: {}]   ;;  %s2596_s6 = inlined_call_operand.vmem [shape: f32[2048,128], index: 6, kind: output, shape index: {}]  }
   0x1 LB: > { %s1629_s22 = sadd.s32 4294967295, %s2040_s21   ;;  %p1633_p0 = scmp.ge.s32.totalorder %s2040_s21, 1  ;;  %s2040_s21 = sphi %s2077_s21, %s16_s21  }
   0x2   : > { %p213_p1 = scmp.lt.s32.totalorder %s2040_s21, 3 }
   0x4   : > { %p214_p2 = pnand %p1633_p0, %p213_p1 }
   0x5   : > { %s1634_s7 = sshll.u32 (!%p214_p2), %s1629_s22, 7 }
   0x6   : > { %217 = sbr.rel (%p214_p2) target bundleno = 430 (0x1ae), region = 44  ;;  %p244_p3 = scmp.lt.s32.totalorder (!%p214_p2), %s1634_s7, 255 }
   0xb   : > { %v1999_v0 = vld [vmem:[%s2591_s1 + $0x38] sm:$0xff]  ;;  %v1998_v1 = vld [vmem:[%s2591_s1 + $0x30] sm:$0xff]  ;;  %v1997_v2 = vld [vmem:[%s2591_s1 + $0x28] sm:$0xff]  ;;  %s2598_s7 = smov (!%p244_p3, %s1634_s7), 255 }
   0xc   : > { %854 = vmatpush.bf16.msra.mxu0 %v1999_v0  ;;  %2000 = vmatpush.bf16.msra.mxu1 %v1999_v0  ;;  %v1996_v3 = vld [vmem:[%s2591_s1 + $0x20] sm:$0xff]  ;;  %v1995_v4 = vld [vmem:[%s2591_s1 + $0x18] sm:$0xff]  ;;  %v1994_v5 = vld [vmem:[%s2591_s1 + $0x10] sm:$0xff]  ;;  %s1635_s14 = sshll.u32 %s2598_s7, 2  ;;  %s1637_s29 = sshll.u32 %s2598_s7, 3 }
   0xd   : > { %2001 = vmatpush.bf16.msra.mxu2 %v1999_v0  ;;  %2002 = vmatpush.bf16.msra.mxu3 %v1999_v0  ;;  %v1993_v6 = vld [vmem:[%s2591_s1 + $0x8] sm:$0xff]  ;;  %v1992_v7 = vld [vmem:[%s2591_s1] sm:$0xff]  ;;  %s2115_s19 = scalar_lea.vmem %s2590_s0, %s1635_s14  ;;  %s2175_s9 = scalar_lea.vmem %s2596_s6, %s1637_s29 }
   0xe   : > { %v1928_v8 = vld [vmem:[%s2115_s19] sm:$0xff]  ;;  %v1929_v12 = vld [vmem:[%s2115_s19 + $0x8] sm:$0xff]  ;;  %v1930_v16 = vld [vmem:[%s2115_s19 + $0x10] sm:$0xff] }
   0xf   : > { %v1944_v9 = vld [vmem:[%s2115_s19 + $0x80] sm:$0xff]  ;;  %v1945_v13 = vld [vmem:[%s2115_s19 + $0x88] sm:$0xff]  ;;  %v1946_v17 = vld [vmem:[%s2115_s19 + $0x90] sm:$0xff] }
  0x10   : > { %855 = vmatpush.bf16.msra.mxu0 %v1998_v1  ;;  %2003 = vmatpush.bf16.msra.mxu1 %v1998_v1  ;;  %v1960_v10 = vld [vmem:[%s2115_s19 + $0x100] sm:$0xff]  ;;  %v1961_v14 = vld [vmem:[%s2115_s19 + $0x108] sm:$0xff]  ;;  %v1962_v18 = vld [vmem:[%s2115_s19 + $0x110] sm:$0xff] }
  0x11   : > { %2004 = vmatpush.bf16.msra.mxu2 %v1998_v1  ;;  %2005 = vmatpush.bf16.msra.mxu3 %v1998_v1  ;;  %v1976_v11 = vld [vmem:[%s2115_s19 + $0x180] sm:$0xff]  ;;  %v1977_v15 = vld [vmem:[%s2115_s19 + $0x188] sm:$0xff]  ;;  %v1978_v19 = vld [vmem:[%s2115_s19 + $0x190] sm:$0xff] }
  0x12   : > { %v1931_v20 = vld [vmem:[%s2115_s19 + $0x18] sm:$0xff]  ;;  %v1932_v24 = vld [vmem:[%s2115_s19 + $0x20] sm:$0xff]  ;;  %v1933_v35 = vld [vmem:[%s2115_s19 + $0x28] sm:$0xff] }
  0x13   : > { %v1947_v21 = vld [vmem:[%s2115_s19 + $0x98] sm:$0xff]  ;;  %v1948_v25 = vld [vmem:[%s2115_s19 + $0xa0] sm:$0xff]  ;;  %v1949_v36 = vld [vmem:[%s2115_s19 + $0xa8] sm:$0xff] }
  0x14   : > { %856 = vmatpush.bf16.msra.mxu0 %v1997_v2  ;;  %2006 = vmatpush.bf16.msra.mxu1 %v1997_v2  ;;  %v1963_v22 = vld [vmem:[%s2115_s19 + $0x118] sm:$0xff]  ;;  %v1964_v26 = vld [vmem:[%s2115_s19 + $0x120] sm:$0xff]  ;;  %v1965_v38 = vld [vmem:[%s2115_s19 + $0x128] sm:$0xff] }
  0x15   : > { %2007 = vmatpush.bf16.msra.mxu2 %v1997_v2  ;;  %2008 = vmatpush.bf16.msra.mxu3 %v1997_v2  ;;  %v1979_v23 = vld [vmem:[%s2115_s19 + $0x198] sm:$0xff]  ;;  %v1980_v27 = vld [vmem:[%s2115_s19 + $0x1a0] sm:$0xff]  ;;  %v1981_v39 = vld [vmem:[%s2115_s19 + $0x1a8] sm:$0xff] }
  0x16   : > { %v255_v28 = vld [vmem:[%s2592_s2] sm:$0x1]  ;;  %v1934_v42 = vld [vmem:[%s2115_s19 + $0x30] sm:$0xff]  ;;  %v1935_v50 = vld [vmem:[%s2115_s19 + $0x38] sm:$0xff] }
  0x17   : > { %v259_v29 = vmul.f32 0.0005202914, %v255_v28  ;;  %v256_v30 = vld [vmem:[%s2593_s3] sm:$0x1]  ;;  %v1950_v43 = vld [vmem:[%s2115_s19 + $0xb0] sm:$0xff]  ;;  %v1951_v51 = vld [vmem:[%s2115_s19 + $0xb8] sm:$0xff] }
  0x18   : > { %857 = vmatpush.bf16.msra.mxu0 %v1996_v3  ;;  %2009 = vmatpush.bf16.msra.mxu1 %v1996_v3  ;;  %v260_v31 = vmul.f32 0.0005202914, %v256_v30  ;;  %v1966_v44 = vld [vmem:[%s2115_s19 + $0x130] sm:$0xff]  ;;  %v1967_v52 = vld [vmem:[%s2115_s19 + $0x138] sm:$0xff]  ;;  %v257_v54 = vld [vmem:[%s2594_s4] sm:$0x1] }
  0x19   : > { %2010 = vmatpush.bf16.msra.mxu2 %v1996_v3  ;;  %2011 = vmatpush.bf16.msra.mxu3 %v1996_v3  ;;  %v261_v32 = vmul.f32 %v259_v29, %v259_v29  ;;  %v1982_v45 = vld [vmem:[%s2115_s19 + $0x1b0] sm:$0xff]  ;;  %v1983_v53 = vld [vmem:[%s2115_s19 + $0x1b8] sm:$0xff]  ;;  %v258_v58 = vld [vmem:[%s2595_s5] sm:$0x1] }
  0x1a   : > { %v1936_v62 = vld [vmem:[%s2115_s19 + $0x40] sm:$0xff]  ;;  %v1969_v28 = vld [vmem:[%s2115_s19 + $0x148] sm:$0xff] }
  0x1b   : > { %v262_v33 = vsub.f32 %v260_v31, %v261_v32  ;;  %v1952_v63 = vld [vmem:[%s2115_s19 + $0xc0] sm:$0xff] }
  0x1c   : > { %858 = vmatpush.bf16.msra.mxu0 %v1995_v4  ;;  %2012 = vmatpush.bf16.msra.mxu1 %v1995_v4  ;;  %v1968_v2 = vld [vmem:[%s2115_s19 + $0x140] sm:$0xff] }
  0x1d   : > { %2013 = vmatpush.bf16.msra.mxu2 %v1995_v4  ;;  %2014 = vmatpush.bf16.msra.mxu3 %v1995_v4  ;;  %v263_v34 = vmax.f32 %v262_v33, 0.0  ;;  %v1984_v3 = vld [vmem:[%s2115_s19 + $0x1c0] sm:$0xff] }
  0x1f   : > { %v264_v37 = vadd.f32 1e-05, %v263_v34 }
  0x20   : > { %859 = vmatpush.bf16.msra.mxu0 %v1994_v5  ;;  %2015 = vmatpush.bf16.msra.mxu1 %v1994_v5 }
  0x21   : > { %2016 = vmatpush.bf16.msra.mxu2 %v1994_v5  ;;  %2017 = vmatpush.bf16.msra.mxu3 %v1994_v5  ;;  %2032 = vrsqrt.f32 %v264_v37  ;;  %vm271_vm0 = vweird.f32 %v264_v37 }
  0x24   : > { %860 = vmatpush.bf16.msra.mxu0 %v1993_v6  ;;  %2018 = vmatpush.bf16.msra.mxu1 %v1993_v6 }
  0x25   : > { %2019 = vmatpush.bf16.msra.mxu2 %v1993_v6  ;;  %2020 = vmatpush.bf16.msra.mxu3 %v1993_v6 }
  0x27   : > { %v2033_v40 = vpop.eup %2032 }
  0x28   : > { %861 = vmatpush.bf16.msra.mxu0 %v1992_v7  ;;  %2021 = vmatpush.bf16.msra.mxu1 %v1992_v7  ;;  %v266_v41 = vmul.f32 %v2033_v40, %v264_v37  ;;  %vm272_vm1 = vweird.f32 %v2033_v40 }
  0x29   : > { %2022 = vmatpush.bf16.msra.mxu2 %v1992_v7  ;;  %2023 = vmatpush.bf16.msra.mxu3 %v1992_v7  ;;  %vm273_vm2 = vmor %vm271_vm0, %vm272_vm1 }
  0x2a   : > { %v267_v46 = vmul.f32 %v2033_v40, %v266_v41 }
  0x2b   : > { %862 = vmatmul.bf16.vlgmr.msra.gmra.mxu0 %v1928_v8  ;;  %942 = vmatmul.bf16.vlgmr.msra.gmra.mxu1 %v1944_v9 }
  0x2c   : > { %1022 = vmatmul.bf16.vlgmr.msra.gmra.mxu2 %v1960_v10  ;;  %1102 = vmatmul.bf16.vlgmr.msra.gmra.mxu3 %v1976_v11  ;;  %v268_v47 = vmul.f32 0.5, %v267_v46 }
  0x2e   : > { %v269_v48 = vsub.f32 1.5, %v268_v47 }
  0x30   : > { %v270_v49 = vmul.f32 %v2033_v40, %v269_v48 }
  0x32   : > { %v274_v55 = vsel %vm273_vm2, %v2033_v40, %v270_v49 }
  0x33   : > { %v275_v56 = vmul.f32 %v274_v55, %v257_v54 }
  0x35   : > { %v276_v57 = vmul.f32 %v275_v56, %v259_v29  ;;  %v2161_v60 = vperm.slane %v275_v56, 0  ;;  %v1985_v29 = vld [vmem:[%s2115_s19 + $0x1c8] sm:$0xff]  ;;  %v1970_v56 = vld [vmem:[%s2115_s19 + $0x150] sm:$0xff] }
  0x37   : > { %v277_v59 = vsub.f32 %v258_v58, %v276_v57  ;;  %v1986_v57 = vld [vmem:[%s2115_s19 + $0x1d0] sm:$0xff] }
  0x39   : > { %v2164_v61 = vperm.slane %v277_v59, 0 }
  0x3b   : > { %867 = vmatmul.bf16.gmra.mxu0 %v1929_v12  ;;  %947 = vmatmul.bf16.gmra.mxu1 %v1945_v13 }
  0x3c   : > { %1027 = vmatmul.bf16.gmra.mxu2 %v1961_v14  ;;  %1107 = vmatmul.bf16.gmra.mxu3 %v1977_v15 }
  0x4b   : > { %872 = vmatmul.bf16.gmra.mxu0 %v1930_v16  ;;  %952 = vmatmul.bf16.gmra.mxu1 %v1946_v17 }
  0x4c   : > { %1032 = vmatmul.bf16.gmra.mxu2 %v1962_v18  ;;  %1112 = vmatmul.bf16.gmra.mxu3 %v1978_v19 }
  0x5b   : > { %877 = vmatmul.bf16.gmra.mxu0 %v1931_v20  ;;  %957 = vmatmul.bf16.gmra.mxu1 %v1947_v21 }
  0x5c   : > { %1037 = vmatmul.bf16.gmra.mxu2 %v1963_v22  ;;  %1117 = vmatmul.bf16.gmra.mxu3 %v1979_v23  ;;  %v1937_v22 = vld [vmem:[%s2115_s19 + $0x48] sm:$0xff] }
  0x5d   : > { %v1953_v23 = vld [vmem:[%s2115_s19 + $0xc8] sm:$0xff] }
  0x6b   : > { %882 = vmatmul.bf16.gmra.mxu0 %v1932_v24  ;;  %962 = vmatmul.bf16.gmra.mxu1 %v1948_v25 }
  0x6c   : > { %1042 = vmatmul.bf16.gmra.mxu2 %v1964_v26  ;;  %1122 = vmatmul.bf16.gmra.mxu3 %v1980_v27 }
  0x7b   : > { %887 = vmatmul.bf16.gmra.mxu0 %v1933_v35  ;;  %967 = vmatmul.bf16.gmra.mxu1 %v1949_v36 }
  0x7c   : > { %1047 = vmatmul.bf16.gmra.mxu2 %v1965_v38  ;;  %1127 = vmatmul.bf16.gmra.mxu3 %v1981_v39 }
  0x8b   : > { %892 = vmatmul.bf16.gmra.mxu0 %v1934_v42  ;;  %972 = vmatmul.bf16.gmra.mxu1 %v1950_v43 }
  0x8c   : > { %1052 = vmatmul.bf16.gmra.mxu2 %v1966_v44  ;;  %1132 = vmatmul.bf16.gmra.mxu3 %v1982_v45 }
  0x9b   : > { %897 = vmatmul.bf16.gmra.mxu0 %v1935_v50  ;;  %977 = vmatmul.bf16.gmra.mxu1 %v1951_v51  ;;  %v1938_v50 = vld [vmem:[%s2115_s19 + $0x50] sm:$0xff] }
  0x9c   : > { %1057 = vmatmul.bf16.gmra.mxu2 %v1967_v52  ;;  %1137 = vmatmul.bf16.gmra.mxu3 %v1983_v53  ;;  %v1954_v51 = vld [vmem:[%s2115_s19 + $0xd0] sm:$0xff] }
  0xa8   : > { %v863_v0 = vpop.f32.mrf.mxu0  ;;  %v943_v1 = vpop.f32.mrf.mxu1 }
  0xa9   : > { %v1186_v4 = vmul.f32 %v2161_v60, %v863_v0  ;;  %v1218_v5 = vmul.f32 %v2161_v60, %v943_v1 }
  0xab   : > { %v1317_v6 = vadd.f32 %v2164_v61, %v1186_v4  ;;  %v1349_v7 = vadd.f32 %v2164_v61, %v1218_v5  ;;  %902 = vmatmul.bf16.gmra.mxu0 %v1936_v62  ;;  %982 = vmatmul.bf16.gmra.mxu1 %v1952_v63 }
  0xac   : > { %1062 = vmatmul.bf16.gmra.mxu2 %v1968_v2  ;;  %1142 = vmatmul.bf16.gmra.mxu3 %v1984_v3 }
  0xad   : > { %1445 = vst [vmem:[%s2175_s9] sm:$0xff] %v1317_v6 }
  0xae   : > { %1477 = vst [vmem:[%s2175_s9 + $0x100] sm:$0xff] %v1349_v7 }
  0xaf   : > { %v1023_v8 = vpop.f32.mrf.mxu2  ;;  %v1103_v9 = vpop.f32.mrf.mxu3 }
  0xb0   : > { %v1250_v10 = vmul.f32 %v2161_v60, %v1023_v8  ;;  %v1282_v11 = vmul.f32 %v2161_v60, %v1103_v9  ;;  %v865_v12 = vpop.f32.mrf.mxu0  ;;  %v945_v13 = vpop.f32.mrf.mxu1 }
  0xb1   : > { %v1187_v14 = vmul.f32 %v2161_v60, %v865_v12  ;;  %v1219_v15 = vmul.f32 %v2161_v60, %v945_v13 }
  0xb2   : > { %v1381_v16 = vadd.f32 %v2164_v61, %v1250_v10  ;;  %v1413_v17 = vadd.f32 %v2164_v61, %v1282_v11 }
  0xb3   : > { %v1318_v18 = vadd.f32 %v2164_v61, %v1187_v14  ;;  %v1350_v19 = vadd.f32 %v2164_v61, %v1219_v15 }
  0xb4   : > { %1509 = vst [vmem:[%s2175_s9 + $0x200] sm:$0xff] %v1381_v16  ;;  %v1939_v16 = vld [vmem:[%s2115_s19 + $0x58] sm:$0xff] }
  0xb5   : > { %1541 = vst [vmem:[%s2175_s9 + $0x300] sm:$0xff] %v1413_v17  ;;  %v1955_v17 = vld [vmem:[%s2115_s19 + $0xd8] sm:$0xff] }
  0xb6   : > { %1446 = vst [vmem:[%s2175_s9 + $0x8] sm:$0xff] %v1318_v18 }
  0xb7   : > { %1478 = vst [vmem:[%s2175_s9 + $0x108] sm:$0xff] %v1350_v19  ;;  %v1025_v20 = vpop.f32.mrf.mxu2  ;;  %v1105_v21 = vpop.f32.mrf.mxu3 }
  0xb8   : > { %v1251_v24 = vmul.f32 %v2161_v60, %v1025_v20  ;;  %v1283_v25 = vmul.f32 %v2161_v60, %v1105_v21  ;;  %v868_v26 = vpop.f32.mrf.mxu0  ;;  %v948_v27 = vpop.f32.mrf.mxu1 }
  0xb9   : > { %v1188_v30 = vmul.f32 %v2161_v60, %v868_v26  ;;  %v1220_v31 = vmul.f32 %v2161_v60, %v948_v27 }
  0xba   : > { %v1382_v32 = vadd.f32 %v2164_v61, %v1251_v24  ;;  %v1414_v33 = vadd.f32 %v2164_v61, %v1283_v25 }
  0xbb   : > { %v1319_v34 = vadd.f32 %v2164_v61, %v1188_v30  ;;  %v1351_v35 = vadd.f32 %v2164_v61, %v1220_v31  ;;  %907 = vmatmul.bf16.gmra.mxu0 %v1937_v22  ;;  %987 = vmatmul.bf16.gmra.mxu1 %v1953_v23  ;;  %v1971_v22 = vld [vmem:[%s2115_s19 + $0x158] sm:$0xff] }
  0xbc   : > { %1510 = vst [vmem:[%s2175_s9 + $0x208] sm:$0xff] %v1382_v32  ;;  %1067 = vmatmul.bf16.gmra.mxu2 %v1969_v28  ;;  %1147 = vmatmul.bf16.gmra.mxu3 %v1985_v29  ;;  %v1987_v23 = vld [vmem:[%s2115_s19 + $0x1d8] sm:$0xff] }
  0xbd   : > { %1542 = vst [vmem:[%s2175_s9 + $0x308] sm:$0xff] %v1414_v33 }
  0xbe   : > { %1447 = vst [vmem:[%s2175_s9 + $0x10] sm:$0xff] %v1319_v34 }
  0xbf   : > { %1479 = vst [vmem:[%s2175_s9 + $0x110] sm:$0xff] %v1351_v35  ;;  %v1028_v36 = vpop.f32.mrf.mxu2  ;;  %v1108_v37 = vpop.f32.mrf.mxu3 }
  0xc0   : > { %v1252_v38 = vmul.f32 %v2161_v60, %v1028_v36  ;;  %v1284_v39 = vmul.f32 %v2161_v60, %v1108_v37  ;;  %v870_v40 = vpop.f32.mrf.mxu0  ;;  %v950_v41 = vpop.f32.mrf.mxu1 }
  0xc1   : > { %v1189_v42 = vmul.f32 %v2161_v60, %v870_v40  ;;  %v1221_v43 = vmul.f32 %v2161_v60, %v950_v41 }
  0xc2   : > { %v1383_v44 = vadd.f32 %v2164_v61, %v1252_v38  ;;  %v1415_v45 = vadd.f32 %v2164_v61, %v1284_v39 }
  0xc3   : > { %v1320_v46 = vadd.f32 %v2164_v61, %v1189_v42  ;;  %v1352_v47 = vadd.f32 %v2164_v61, %v1221_v43 }
  0xc4   : > { %1511 = vst [vmem:[%s2175_s9 + $0x210] sm:$0xff] %v1383_v44  ;;  %v1940_v44 = vld [vmem:[%s2115_s19 + $0x60] sm:$0xff] }
  0xc5   : > { %1543 = vst [vmem:[%s2175_s9 + $0x310] sm:$0xff] %v1415_v45  ;;  %v1956_v45 = vld [vmem:[%s2115_s19 + $0xe0] sm:$0xff] }
  0xc6   : > { %1448 = vst [vmem:[%s2175_s9 + $0x18] sm:$0xff] %v1320_v46 }
  0xc7   : > { %1480 = vst [vmem:[%s2175_s9 + $0x118] sm:$0xff] %v1352_v47  ;;  %v1030_v48 = vpop.f32.mrf.mxu2  ;;  %v1110_v49 = vpop.f32.mrf.mxu3 }
  0xc8   : > { %v1253_v52 = vmul.f32 %v2161_v60, %v1030_v48  ;;  %v1285_v53 = vmul.f32 %v2161_v60, %v1110_v49  ;;  %v873_v54 = vpop.f32.mrf.mxu0  ;;  %v953_v55 = vpop.f32.mrf.mxu1 }
  0xc9   : > { %v1190_v58 = vmul.f32 %v2161_v60, %v873_v54  ;;  %v1222_v59 = vmul.f32 %v2161_v60, %v953_v55 }
  0xca   : > { %v1384_v62 = vadd.f32 %v2164_v61, %v1253_v52  ;;  %v1416_v63 = vadd.f32 %v2164_v61, %v1285_v53 }
  0xcb   : > { %v1321_v0 = vadd.f32 %v2164_v61, %v1190_v58  ;;  %v1353_v1 = vadd.f32 %v2164_v61, %v1222_v59  ;;  %912 = vmatmul.bf16.gmra.mxu0 %v1938_v50  ;;  %992 = vmatmul.bf16.gmra.mxu1 %v1954_v51  ;;  %v1972_v50 = vld [vmem:[%s2115_s19 + $0x160] sm:$0xff] }
  0xcc   : > { %1512 = vst [vmem:[%s2175_s9 + $0x218] sm:$0xff] %v1384_v62  ;;  %1072 = vmatmul.bf16.gmra.mxu2 %v1970_v56  ;;  %1152 = vmatmul.bf16.gmra.mxu3 %v1986_v57  ;;  %v1988_v51 = vld [vmem:[%s2115_s19 + $0x1e0] sm:$0xff] }
  0xcd   : > { %1544 = vst [vmem:[%s2175_s9 + $0x318] sm:$0xff] %v1416_v63 }
  0xce   : > { %1449 = vst [vmem:[%s2175_s9 + $0x20] sm:$0xff] %v1321_v0 }
  0xcf   : > { %1481 = vst [vmem:[%s2175_s9 + $0x120] sm:$0xff] %v1353_v1  ;;  %v1033_v2 = vpop.f32.mrf.mxu2  ;;  %v1113_v3 = vpop.f32.mrf.mxu3 }
  0xd0   : > { %v1254_v4 = vmul.f32 %v2161_v60, %v1033_v2  ;;  %v1286_v5 = vmul.f32 %v2161_v60, %v1113_v3  ;;  %v875_v6 = vpop.f32.mrf.mxu0  ;;  %v955_v7 = vpop.f32.mrf.mxu1 }
  0xd1   : > { %v1191_v8 = vmul.f32 %v2161_v60, %v875_v6  ;;  %v1223_v9 = vmul.f32 %v2161_v60, %v955_v7 }
  0xd2   : > { %v1385_v10 = vadd.f32 %v2164_v61, %v1254_v4  ;;  %v1417_v11 = vadd.f32 %v2164_v61, %v1286_v5 }
  0xd3   : > { %v1322_v12 = vadd.f32 %v2164_v61, %v1191_v8  ;;  %v1354_v13 = vadd.f32 %v2164_v61, %v1223_v9 }
  0xd4   : > { %1513 = vst [vmem:[%s2175_s9 + $0x220] sm:$0xff] %v1385_v10  ;;  %v1941_v10 = vld [vmem:[%s2115_s19 + $0x68] sm:$0xff] }
  0xd5   : > { %1545 = vst [vmem:[%s2175_s9 + $0x320] sm:$0xff] %v1417_v11  ;;  %v1957_v11 = vld [vmem:[%s2115_s19 + $0xe8] sm:$0xff] }
  0xd6   : > { %1450 = vst [vmem:[%s2175_s9 + $0x28] sm:$0xff] %v1322_v12 }
  0xd7   : > { %1482 = vst [vmem:[%s2175_s9 + $0x128] sm:$0xff] %v1354_v13  ;;  %v1035_v14 = vpop.f32.mrf.mxu2  ;;  %v1115_v15 = vpop.f32.mrf.mxu3 }
  0xd8   : > { %v1255_v18 = vmul.f32 %v2161_v60, %v1035_v14  ;;  %v1287_v19 = vmul.f32 %v2161_v60, %v1115_v15  ;;  %v878_v20 = vpop.f32.mrf.mxu0  ;;  %v958_v21 = vpop.f32.mrf.mxu1 }
  0xd9   : > { %v1192_v24 = vmul.f32 %v2161_v60, %v878_v20  ;;  %v1224_v25 = vmul.f32 %v2161_v60, %v958_v21 }
  0xda   : > { %v1386_v26 = vadd.f32 %v2164_v61, %v1255_v18  ;;  %v1418_v27 = vadd.f32 %v2164_v61, %v1287_v19 }
  0xdb   : > { %v1323_v28 = vadd.f32 %v2164_v61, %v1192_v24  ;;  %v1355_v29 = vadd.f32 %v2164_v61, %v1224_v25  ;;  %917 = vmatmul.bf16.gmra.mxu0 %v1939_v16  ;;  %997 = vmatmul.bf16.gmra.mxu1 %v1955_v17  ;;  %v1973_v16 = vld [vmem:[%s2115_s19 + $0x168] sm:$0xff] }
  0xdc   : > { %1514 = vst [vmem:[%s2175_s9 + $0x228] sm:$0xff] %v1386_v26  ;;  %1077 = vmatmul.bf16.gmra.mxu2 %v1971_v22  ;;  %1157 = vmatmul.bf16.gmra.mxu3 %v1987_v23  ;;  %v1989_v17 = vld [vmem:[%s2115_s19 + $0x1e8] sm:$0xff] }
  0xdd   : > { %1546 = vst [vmem:[%s2175_s9 + $0x328] sm:$0xff] %v1418_v27 }
  0xde   : > { %1451 = vst [vmem:[%s2175_s9 + $0x30] sm:$0xff] %v1323_v28 }
  0xdf   : > { %1483 = vst [vmem:[%s2175_s9 + $0x130] sm:$0xff] %v1355_v29  ;;  %v1038_v30 = vpop.f32.mrf.mxu2  ;;  %v1118_v31 = vpop.f32.mrf.mxu3 }
  0xe0   : > { %v1256_v32 = vmul.f32 %v2161_v60, %v1038_v30  ;;  %v1288_v33 = vmul.f32 %v2161_v60, %v1118_v31  ;;  %v880_v34 = vpop.f32.mrf.mxu0  ;;  %v960_v35 = vpop.f32.mrf.mxu1 }
  0xe1   : > { %v1193_v36 = vmul.f32 %v2161_v60, %v880_v34  ;;  %v1225_v37 = vmul.f32 %v2161_v60, %v960_v35 }
  0xe2   : > { %v1387_v38 = vadd.f32 %v2164_v61, %v1256_v32  ;;  %v1419_v39 = vadd.f32 %v2164_v61, %v1288_v33 }
  0xe3   : > { %v1324_v40 = vadd.f32 %v2164_v61, %v1193_v36  ;;  %v1356_v41 = vadd.f32 %v2164_v61, %v1225_v37 }
  0xe4   : > { %1515 = vst [vmem:[%s2175_s9 + $0x230] sm:$0xff] %v1387_v38  ;;  %v1942_v38 = vld [vmem:[%s2115_s19 + $0x70] sm:$0xff] }
  0xe5   : > { %1547 = vst [vmem:[%s2175_s9 + $0x330] sm:$0xff] %v1419_v39  ;;  %v1958_v39 = vld [vmem:[%s2115_s19 + $0xf0] sm:$0xff] }
  0xe6   : > { %1452 = vst [vmem:[%s2175_s9 + $0x38] sm:$0xff] %v1324_v40 }
  0xe7   : > { %1484 = vst [vmem:[%s2175_s9 + $0x138] sm:$0xff] %v1356_v41  ;;  %v1040_v42 = vpop.f32.mrf.mxu2  ;;  %v1120_v43 = vpop.f32.mrf.mxu3 }
  0xe8   : > { %v1257_v46 = vmul.f32 %v2161_v60, %v1040_v42  ;;  %v1289_v47 = vmul.f32 %v2161_v60, %v1120_v43  ;;  %v883_v48 = vpop.f32.mrf.mxu0  ;;  %v963_v49 = vpop.f32.mrf.mxu1 }
  0xe9   : > { %v1194_v52 = vmul.f32 %v2161_v60, %v883_v48  ;;  %v1226_v53 = vmul.f32 %v2161_v60, %v963_v49 }
  0xea   : > { %v1388_v54 = vadd.f32 %v2164_v61, %v1257_v46  ;;  %v1420_v55 = vadd.f32 %v2164_v61, %v1289_v47 }
  0xeb   : > { %v1325_v56 = vadd.f32 %v2164_v61, %v1194_v52  ;;  %v1357_v57 = vadd.f32 %v2164_v61, %v1226_v53  ;;  %922 = vmatmul.bf16.gmra.mxu0 %v1940_v44  ;;  %1002 = vmatmul.bf16.gmra.mxu1 %v1956_v45  ;;  %v1974_v44 = vld [vmem:[%s2115_s19 + $0x170] sm:$0xff] }
  0xec   : > { %1516 = vst [vmem:[%s2175_s9 + $0x238] sm:$0xff] %v1388_v54  ;;  %1082 = vmatmul.bf16.gmra.mxu2 %v1972_v50  ;;  %1162 = vmatmul.bf16.gmra.mxu3 %v1988_v51  ;;  %v1990_v45 = vld [vmem:[%s2115_s19 + $0x1f0] sm:$0xff] }
  0xed   : > { %1548 = vst [vmem:[%s2175_s9 + $0x338] sm:$0xff] %v1420_v55 }
  0xee   : > { %1453 = vst [vmem:[%s2175_s9 + $0x40] sm:$0xff] %v1325_v56 }
  0xef   : > { %1485 = vst [vmem:[%s2175_s9 + $0x140] sm:$0xff] %v1357_v57  ;;  %v1043_v58 = vpop.f32.mrf.mxu2  ;;  %v1123_v59 = vpop.f32.mrf.mxu3 }
  0xf0   : > { %v1258_v62 = vmul.f32 %v2161_v60, %v1043_v58  ;;  %v1290_v63 = vmul.f32 %v2161_v60, %v1123_v59  ;;  %v885_v0 = vpop.f32.mrf.mxu0  ;;  %v965_v1 = vpop.f32.mrf.mxu1 }
  0xf1   : > { %v1195_v2 = vmul.f32 %v2161_v60, %v885_v0  ;;  %v1227_v3 = vmul.f32 %v2161_v60, %v965_v1 }
  0xf2   : > { %v1389_v4 = vadd.f32 %v2164_v61, %v1258_v62  ;;  %v1421_v5 = vadd.f32 %v2164_v61, %v1290_v63 }
  0xf3   : > { %v1326_v6 = vadd.f32 %v2164_v61, %v1195_v2  ;;  %v1358_v7 = vadd.f32 %v2164_v61, %v1227_v3 }
  0xf4   : > { %1517 = vst [vmem:[%s2175_s9 + $0x240] sm:$0xff] %v1389_v4  ;;  %v1943_v4 = vld [vmem:[%s2115_s19 + $0x78] sm:$0xff] }
  0xf5   : > { %1549 = vst [vmem:[%s2175_s9 + $0x340] sm:$0xff] %v1421_v5  ;;  %v1959_v5 = vld [vmem:[%s2115_s19 + $0xf8] sm:$0xff] }
  0xf6   : > { %1454 = vst [vmem:[%s2175_s9 + $0x48] sm:$0xff] %v1326_v6 }
  0xf7   : > { %1486 = vst [vmem:[%s2175_s9 + $0x148] sm:$0xff] %v1358_v7  ;;  %v1045_v8 = vpop.f32.mrf.mxu2  ;;  %v1125_v9 = vpop.f32.mrf.mxu3 }
  0xf8   : > { %v1259_v12 = vmul.f32 %v2161_v60, %v1045_v8  ;;  %v1291_v13 = vmul.f32 %v2161_v60, %v1125_v9  ;;  %v888_v14 = vpop.f32.mrf.mxu0  ;;  %v968_v15 = vpop.f32.mrf.mxu1 }
  0xf9   : > { %v1196_v18 = vmul.f32 %v2161_v60, %v888_v14  ;;  %v1228_v19 = vmul.f32 %v2161_v60, %v968_v15 }
  0xfa   : > { %v1390_v20 = vadd.f32 %v2164_v61, %v1259_v12  ;;  %v1422_v21 = vadd.f32 %v2164_v61, %v1291_v13 }
  0xfb   : > { %v1327_v22 = vadd.f32 %v2164_v61, %v1196_v18  ;;  %v1359_v23 = vadd.f32 %v2164_v61, %v1228_v19  ;;  %927 = vmatmul.bf16.gmra.mxu0 %v1941_v10  ;;  %1007 = vmatmul.bf16.gmra.mxu1 %v1957_v11  ;;  %v1975_v10 = vld [vmem:[%s2115_s19 + $0x178] sm:$0xff] }
  0xfc   : > { %1518 = vst [vmem:[%s2175_s9 + $0x248] sm:$0xff] %v1390_v20  ;;  %1087 = vmatmul.bf16.gmra.mxu2 %v1973_v16  ;;  %1167 = vmatmul.bf16.gmra.mxu3 %v1989_v17  ;;  %v1991_v11 = vld [vmem:[%s2115_s19 + $0x1f8] sm:$0xff] }
  0xfd   : > { %1550 = vst [vmem:[%s2175_s9 + $0x348] sm:$0xff] %v1422_v21 }
  0xfe   : > { %1455 = vst [vmem:[%s2175_s9 + $0x50] sm:$0xff] %v1327_v22 }
  0xff   : > { %1487 = vst [vmem:[%s2175_s9 + $0x150] sm:$0xff] %v1359_v23  ;;  %v1048_v24 = vpop.f32.mrf.mxu2  ;;  %v1128_v25 = vpop.f32.mrf.mxu3 }
 0x100   : > { %v1260_v26 = vmul.f32 %v2161_v60, %v1048_v24  ;;  %v1292_v27 = vmul.f32 %v2161_v60, %v1128_v25  ;;  %v890_v28 = vpop.f32.mrf.mxu0  ;;  %v970_v29 = vpop.f32.mrf.mxu1 }
 0x101   : > { %v1197_v30 = vmul.f32 %v2161_v60, %v890_v28  ;;  %v1229_v31 = vmul.f32 %v2161_v60, %v970_v29 }
 0x102   : > { %v1391_v32 = vadd.f32 %v2164_v61, %v1260_v26  ;;  %v1423_v33 = vadd.f32 %v2164_v61, %v1292_v27 }
 0x103   : > { %v1328_v34 = vadd.f32 %v2164_v61, %v1197_v30  ;;  %v1360_v35 = vadd.f32 %v2164_v61, %v1229_v31 }
 0x104   : > { %1519 = vst [vmem:[%s2175_s9 + $0x250] sm:$0xff] %v1391_v32 }
 0x105   : > { %1551 = vst [vmem:[%s2175_s9 + $0x350] sm:$0xff] %v1423_v33 }
 0x106   : > { %1456 = vst [vmem:[%s2175_s9 + $0x58] sm:$0xff] %v1328_v34 }
 0x107   : > { %1488 = vst [vmem:[%s2175_s9 + $0x158] sm:$0xff] %v1360_v35  ;;  %v1050_v36 = vpop.f32.mrf.mxu2  ;;  %v1130_v37 = vpop.f32.mrf.mxu3 }
 0x108   : > { %v1261_v40 = vmul.f32 %v2161_v60, %v1050_v36  ;;  %v1293_v41 = vmul.f32 %v2161_v60, %v1130_v37  ;;  %v893_v42 = vpop.f32.mrf.mxu0  ;;  %v973_v43 = vpop.f32.mrf.mxu1 }
 0x109   : > { %v1198_v46 = vmul.f32 %v2161_v60, %v893_v42  ;;  %v1230_v47 = vmul.f32 %v2161_v60, %v973_v43 }
 0x10a   : > { %v1392_v48 = vadd.f32 %v2164_v61, %v1261_v40  ;;  %v1424_v49 = vadd.f32 %v2164_v61, %v1293_v41 }
 0x10b   : > { %v1329_v50 = vadd.f32 %v2164_v61, %v1198_v46  ;;  %v1361_v51 = vadd.f32 %v2164_v61, %v1230_v47  ;;  %932 = vmatmul.bf16.gmra.mxu0 %v1942_v38  ;;  %1012 = vmatmul.bf16.gmra.mxu1 %v1958_v39 }
 0x10c   : > { %1520 = vst [vmem:[%s2175_s9 + $0x258] sm:$0xff] %v1392_v48  ;;  %1092 = vmatmul.bf16.gmra.mxu2 %v1974_v44  ;;  %1172 = vmatmul.bf16.gmra.mxu3 %v1990_v45 }
 0x10d   : > { %1552 = vst [vmem:[%s2175_s9 + $0x358] sm:$0xff] %v1424_v49 }
 0x10e   : > { %1457 = vst [vmem:[%s2175_s9 + $0x60] sm:$0xff] %v1329_v50 }
 0x10f   : > { %1489 = vst [vmem:[%s2175_s9 + $0x160] sm:$0xff] %v1361_v51  ;;  %v1053_v52 = vpop.f32.mrf.mxu2  ;;  %v1133_v53 = vpop.f32.mrf.mxu3 }
 0x110   : > { %v1262_v54 = vmul.f32 %v2161_v60, %v1053_v52  ;;  %v1294_v55 = vmul.f32 %v2161_v60, %v1133_v53  ;;  %v895_v56 = vpop.f32.mrf.mxu0  ;;  %v975_v57 = vpop.f32.mrf.mxu1 }
 0x111   : > { %v1199_v58 = vmul.f32 %v2161_v60, %v895_v56  ;;  %v1231_v59 = vmul.f32 %v2161_v60, %v975_v57 }
 0x112   : > { %v1393_v62 = vadd.f32 %v2164_v61, %v1262_v54  ;;  %v1425_v63 = vadd.f32 %v2164_v61, %v1294_v55 }
 0x113   : > { %v1330_v0 = vadd.f32 %v2164_v61, %v1199_v58  ;;  %v1362_v1 = vadd.f32 %v2164_v61, %v1231_v59 }
 0x114   : > { %1521 = vst [vmem:[%s2175_s9 + $0x260] sm:$0xff] %v1393_v62 }
 0x115   : > { %1553 = vst [vmem:[%s2175_s9 + $0x360] sm:$0xff] %v1425_v63 }
 0x116   : > { %1458 = vst [vmem:[%s2175_s9 + $0x68] sm:$0xff] %v1330_v0 }
 0x117   : > { %1490 = vst [vmem:[%s2175_s9 + $0x168] sm:$0xff] %v1362_v1  ;;  %v1055_v2 = vpop.f32.mrf.mxu2  ;;  %v1135_v3 = vpop.f32.mrf.mxu3 }
 0x118   : > { %v1263_v6 = vmul.f32 %v2161_v60, %v1055_v2  ;;  %v1295_v7 = vmul.f32 %v2161_v60, %v1135_v3  ;;  %v898_v8 = vpop.f32.mrf.mxu0  ;;  %v978_v9 = vpop.f32.mrf.mxu1 }
 0x119   : > { %v1200_v12 = vmul.f32 %v2161_v60, %v898_v8  ;;  %v1232_v13 = vmul.f32 %v2161_v60, %v978_v9 }
 0x11a   : > { %v1394_v14 = vadd.f32 %v2164_v61, %v1263_v6  ;;  %v1426_v15 = vadd.f32 %v2164_v61, %v1295_v7 }
 0x11b   : > { %v1331_v16 = vadd.f32 %v2164_v61, %v1200_v12  ;;  %v1363_v17 = vadd.f32 %v2164_v61, %v1232_v13  ;;  %937 = vmatmul.bf16.gmra.mxu0 %v1943_v4  ;;  %1017 = vmatmul.bf16.gmra.mxu1 %v1959_v5 }
 0x11c   : > { %1522 = vst [vmem:[%s2175_s9 + $0x268] sm:$0xff] %v1394_v14  ;;  %1097 = vmatmul.bf16.gmra.mxu2 %v1975_v10  ;;  %1177 = vmatmul.bf16.gmra.mxu3 %v1991_v11 }
 0x11d   : > { %1554 = vst [vmem:[%s2175_s9 + $0x368] sm:$0xff] %v1426_v15 }
 0x11e   : > { %1459 = vst [vmem:[%s2175_s9 + $0x70] sm:$0xff] %v1331_v16 }
 0x11f   : > { %1491 = vst [vmem:[%s2175_s9 + $0x170] sm:$0xff] %v1363_v17  ;;  %v1058_v18 = vpop.f32.mrf.mxu2  ;;  %v1138_v19 = vpop.f32.mrf.mxu3 }
 0x120   : > { %v1264_v20 = vmul.f32 %v2161_v60, %v1058_v18  ;;  %v1296_v21 = vmul.f32 %v2161_v60, %v1138_v19  ;;  %v900_v22 = vpop.f32.mrf.mxu0  ;;  %v980_v23 = vpop.f32.mrf.mxu1 }
 0x121   : > { %v1201_v24 = vmul.f32 %v2161_v60, %v900_v22  ;;  %v1233_v25 = vmul.f32 %v2161_v60, %v980_v23 }
 0x122   : > { %v1395_v26 = vadd.f32 %v2164_v61, %v1264_v20  ;;  %v1427_v27 = vadd.f32 %v2164_v61, %v1296_v21 }
 0x123   : > { %v1332_v28 = vadd.f32 %v2164_v61, %v1201_v24  ;;  %v1364_v29 = vadd.f32 %v2164_v61, %v1233_v25 }
 0x124   : > { %1523 = vst [vmem:[%s2175_s9 + $0x270] sm:$0xff] %v1395_v26 }
 0x125   : > { %1555 = vst [vmem:[%s2175_s9 + $0x370] sm:$0xff] %v1427_v27 }
 0x126   : > { %1460 = vst [vmem:[%s2175_s9 + $0x78] sm:$0xff] %v1332_v28 }
 0x127   : > { %1492 = vst [vmem:[%s2175_s9 + $0x178] sm:$0xff] %v1364_v29  ;;  %v1060_v30 = vpop.f32.mrf.mxu2  ;;  %v1140_v31 = vpop.f32.mrf.mxu3 }
 0x128   : > { %v1265_v32 = vmul.f32 %v2161_v60, %v1060_v30  ;;  %v1297_v33 = vmul.f32 %v2161_v60, %v1140_v31  ;;  %v903_v34 = vpop.f32.mrf.mxu0  ;;  %v983_v35 = vpop.f32.mrf.mxu1 }
 0x129   : > { %v1202_v36 = vmul.f32 %v2161_v60, %v903_v34  ;;  %v1234_v37 = vmul.f32 %v2161_v60, %v983_v35 }
 0x12a   : > { %v1396_v38 = vadd.f32 %v2164_v61, %v1265_v32  ;;  %v1428_v39 = vadd.f32 %v2164_v61, %v1297_v33 }
 0x12b   : > { %v1333_v40 = vadd.f32 %v2164_v61, %v1202_v36  ;;  %v1365_v41 = vadd.f32 %v2164_v61, %v1234_v37 }
 0x12c   : > { %1524 = vst [vmem:[%s2175_s9 + $0x278] sm:$0xff] %v1396_v38 }
 0x12d   : > { %1556 = vst [vmem:[%s2175_s9 + $0x378] sm:$0xff] %v1428_v39 }
 0x12e   : > { %1461 = vst [vmem:[%s2175_s9 + $0x80] sm:$0xff] %v1333_v40 }
 0x12f   : > { %1493 = vst [vmem:[%s2175_s9 + $0x180] sm:$0xff] %v1365_v41  ;;  %v1063_v42 = vpop.f32.mrf.mxu2  ;;  %v1143_v43 = vpop.f32.mrf.mxu3 }
 0x130   : > { %v1266_v44 = vmul.f32 %v2161_v60, %v1063_v42  ;;  %v1298_v45 = vmul.f32 %v2161_v60, %v1143_v43  ;;  %v905_v46 = vpop.f32.mrf.mxu0  ;;  %v985_v47 = vpop.f32.mrf.mxu1 }
 0x131   : > { %v1203_v48 = vmul.f32 %v2161_v60, %v905_v46  ;;  %v1235_v49 = vmul.f32 %v2161_v60, %v985_v47 }
 0x132   : > { %v1397_v50 = vadd.f32 %v2164_v61, %v1266_v44  ;;  %v1429_v51 = vadd.f32 %v2164_v61, %v1298_v45 }
 0x133   : > { %v1334_v52 = vadd.f32 %v2164_v61, %v1203_v48  ;;  %v1366_v53 = vadd.f32 %v2164_v61, %v1235_v49 }
 0x134   : > { %1525 = vst [vmem:[%s2175_s9 + $0x280] sm:$0xff] %v1397_v50 }
 0x135   : > { %1557 = vst [vmem:[%s2175_s9 + $0x380] sm:$0xff] %v1429_v51 }
 0x136   : > { %1462 = vst [vmem:[%s2175_s9 + $0x88] sm:$0xff] %v1334_v52 }
 0x137   : > { %1494 = vst [vmem:[%s2175_s9 + $0x188] sm:$0xff] %v1366_v53  ;;  %v1065_v54 = vpop.f32.mrf.mxu2  ;;  %v1145_v55 = vpop.f32.mrf.mxu3 }
 0x138   : > { %v1267_v56 = vmul.f32 %v2161_v60, %v1065_v54  ;;  %v1299_v57 = vmul.f32 %v2161_v60, %v1145_v55  ;;  %v908_v58 = vpop.f32.mrf.mxu0  ;;  %v988_v59 = vpop.f32.mrf.mxu1 }
 0x139   : > { %v1204_v62 = vmul.f32 %v2161_v60, %v908_v58  ;;  %v1236_v63 = vmul.f32 %v2161_v60, %v988_v59 }
 0x13a   : > { %v1398_v0 = vadd.f32 %v2164_v61, %v1267_v56  ;;  %v1430_v1 = vadd.f32 %v2164_v61, %v1299_v57 }
 0x13b   : > { %v1335_v2 = vadd.f32 %v2164_v61, %v1204_v62  ;;  %v1367_v3 = vadd.f32 %v2164_v61, %v1236_v63 }
 0x13c   : > { %1526 = vst [vmem:[%s2175_s9 + $0x288] sm:$0xff] %v1398_v0 }
 0x13d   : > { %1558 = vst [vmem:[%s2175_s9 + $0x388] sm:$0xff] %v1430_v1 }
 0x13e   : > { %1463 = vst [vmem:[%s2175_s9 + $0x90] sm:$0xff] %v1335_v2 }
 0x13f   : > { %1495 = vst [vmem:[%s2175_s9 + $0x190] sm:$0xff] %v1367_v3  ;;  %v1068_v4 = vpop.f32.mrf.mxu2  ;;  %v1148_v5 = vpop.f32.mrf.mxu3 }
 0x140   : > { %v1268_v6 = vmul.f32 %v2161_v60, %v1068_v4  ;;  %v1300_v7 = vmul.f32 %v2161_v60, %v1148_v5  ;;  %v910_v8 = vpop.f32.mrf.mxu0  ;;  %v990_v9 = vpop.f32.mrf.mxu1 }
 0x141   : > { %v1205_v10 = vmul.f32 %v2161_v60, %v910_v8  ;;  %v1237_v11 = vmul.f32 %v2161_v60, %v990_v9 }
 0x142   : > { %v1399_v12 = vadd.f32 %v2164_v61, %v1268_v6  ;;  %v1431_v13 = vadd.f32 %v2164_v61, %v1300_v7 }
 0x143   : > { %v1336_v14 = vadd.f32 %v2164_v61, %v1205_v10  ;;  %v1368_v15 = vadd.f32 %v2164_v61, %v1237_v11 }
 0x144   : > { %1527 = vst [vmem:[%s2175_s9 + $0x290] sm:$0xff] %v1399_v12 }
 0x145   : > { %1559 = vst [vmem:[%s2175_s9 + $0x390] sm:$0xff] %v1431_v13 }
 0x146   : > { %1464 = vst [vmem:[%s2175_s9 + $0x98] sm:$0xff] %v1336_v14 }
 0x147   : > { %1496 = vst [vmem:[%s2175_s9 + $0x198] sm:$0xff] %v1368_v15  ;;  %v1070_v16 = vpop.f32.mrf.mxu2  ;;  %v1150_v17 = vpop.f32.mrf.mxu3 }
 0x148   : > { %v1269_v18 = vmul.f32 %v2161_v60, %v1070_v16  ;;  %v1301_v19 = vmul.f32 %v2161_v60, %v1150_v17  ;;  %v913_v20 = vpop.f32.mrf.mxu0  ;;  %v993_v21 = vpop.f32.mrf.mxu1 }
 0x149   : > { %v1206_v22 = vmul.f32 %v2161_v60, %v913_v20  ;;  %v1238_v23 = vmul.f32 %v2161_v60, %v993_v21 }
 0x14a   : > { %v1400_v24 = vadd.f32 %v2164_v61, %v1269_v18  ;;  %v1432_v25 = vadd.f32 %v2164_v61, %v1301_v19 }
 0x14b   : > { %v1337_v26 = vadd.f32 %v2164_v61, %v1206_v22  ;;  %v1369_v27 = vadd.f32 %v2164_v61, %v1238_v23 }
 0x14c   : > { %1528 = vst [vmem:[%s2175_s9 + $0x298] sm:$0xff] %v1400_v24 }
 0x14d   : > { %1560 = vst [vmem:[%s2175_s9 + $0x398] sm:$0xff] %v1432_v25 }
 0x14e   : > { %1465 = vst [vmem:[%s2175_s9 + $0xa0] sm:$0xff] %v1337_v26 }
 0x14f   : > { %1497 = vst [vmem:[%s2175_s9 + $0x1a0] sm:$0xff] %v1369_v27  ;;  %v1073_v28 = vpop.f32.mrf.mxu2  ;;  %v1153_v29 = vpop.f32.mrf.mxu3 }
 0x150   : > { %v1270_v30 = vmul.f32 %v2161_v60, %v1073_v28  ;;  %v1302_v31 = vmul.f32 %v2161_v60, %v1153_v29  ;;  %v915_v32 = vpop.f32.mrf.mxu0  ;;  %v995_v33 = vpop.f32.mrf.mxu1 }
 0x151   : > { %v1207_v34 = vmul.f32 %v2161_v60, %v915_v32  ;;  %v1239_v35 = vmul.f32 %v2161_v60, %v995_v33 }
 0x152   : > { %v1401_v36 = vadd.f32 %v2164_v61, %v1270_v30  ;;  %v1433_v37 = vadd.f32 %v2164_v61, %v1302_v31 }
 0x153   : > { %v1338_v38 = vadd.f32 %v2164_v61, %v1207_v34  ;;  %v1370_v39 = vadd.f32 %v2164_v61, %v1239_v35 }
 0x154   : > { %1529 = vst [vmem:[%s2175_s9 + $0x2a0] sm:$0xff] %v1401_v36 }
 0x155   : > { %1561 = vst [vmem:[%s2175_s9 + $0x3a0] sm:$0xff] %v1433_v37 }
 0x156   : > { %1466 = vst [vmem:[%s2175_s9 + $0xa8] sm:$0xff] %v1338_v38 }
 0x157   : > { %1498 = vst [vmem:[%s2175_s9 + $0x1a8] sm:$0xff] %v1370_v39  ;;  %v1075_v40 = vpop.f32.mrf.mxu2  ;;  %v1155_v41 = vpop.f32.mrf.mxu3 }
 0x158   : > { %v1271_v42 = vmul.f32 %v2161_v60, %v1075_v40  ;;  %v1303_v43 = vmul.f32 %v2161_v60, %v1155_v41  ;;  %v918_v44 = vpop.f32.mrf.mxu0  ;;  %v998_v45 = vpop.f32.mrf.mxu1 }
 0x159   : > { %v1208_v46 = vmul.f32 %v2161_v60, %v918_v44  ;;  %v1240_v47 = vmul.f32 %v2161_v60, %v998_v45 }
 0x15a   : > { %v1402_v48 = vadd.f32 %v2164_v61, %v1271_v42  ;;  %v1434_v49 = vadd.f32 %v2164_v61, %v1303_v43 }
 0x15b   : > { %v1339_v50 = vadd.f32 %v2164_v61, %v1208_v46  ;;  %v1371_v51 = vadd.f32 %v2164_v61, %v1240_v47 }
 0x15c   : > { %1530 = vst [vmem:[%s2175_s9 + $0x2a8] sm:$0xff] %v1402_v48 }
 0x15d   : > { %1562 = vst [vmem:[%s2175_s9 + $0x3a8] sm:$0xff] %v1434_v49 }
 0x15e   : > { %1467 = vst [vmem:[%s2175_s9 + $0xb0] sm:$0xff] %v1339_v50 }
 0x15f   : > { %1499 = vst [vmem:[%s2175_s9 + $0x1b0] sm:$0xff] %v1371_v51  ;;  %v1078_v52 = vpop.f32.mrf.mxu2  ;;  %v1158_v53 = vpop.f32.mrf.mxu3 }
 0x160   : > { %v1272_v54 = vmul.f32 %v2161_v60, %v1078_v52  ;;  %v1304_v55 = vmul.f32 %v2161_v60, %v1158_v53  ;;  %v920_v56 = vpop.f32.mrf.mxu0  ;;  %v1000_v57 = vpop.f32.mrf.mxu1 }
 0x161   : > { %v1209_v58 = vmul.f32 %v2161_v60, %v920_v56  ;;  %v1241_v59 = vmul.f32 %v2161_v60, %v1000_v57 }
 0x162   : > { %v1403_v62 = vadd.f32 %v2164_v61, %v1272_v54  ;;  %v1435_v63 = vadd.f32 %v2164_v61, %v1304_v55 }
 0x163   : > { %v1340_v0 = vadd.f32 %v2164_v61, %v1209_v58  ;;  %v1372_v1 = vadd.f32 %v2164_v61, %v1241_v59 }
 0x164   : > { %1531 = vst [vmem:[%s2175_s9 + $0x2b0] sm:$0xff] %v1403_v62 }
 0x165   : > { %1563 = vst [vmem:[%s2175_s9 + $0x3b0] sm:$0xff] %v1435_v63 }
 0x166   : > { %1468 = vst [vmem:[%s2175_s9 + $0xb8] sm:$0xff] %v1340_v0 }
 0x167   : > { %1500 = vst [vmem:[%s2175_s9 + $0x1b8] sm:$0xff] %v1372_v1  ;;  %v1080_v2 = vpop.f32.mrf.mxu2  ;;  %v1160_v3 = vpop.f32.mrf.mxu3 }
 0x168   : > { %v1273_v4 = vmul.f32 %v2161_v60, %v1080_v2  ;;  %v1305_v5 = vmul.f32 %v2161_v60, %v1160_v3  ;;  %v923_v6 = vpop.f32.mrf.mxu0  ;;  %v1003_v7 = vpop.f32.mrf.mxu1 }
 0x169   : > { %v1210_v8 = vmul.f32 %v2161_v60, %v923_v6  ;;  %v1242_v9 = vmul.f32 %v2161_v60, %v1003_v7 }
 0x16a   : > { %v1404_v10 = vadd.f32 %v2164_v61, %v1273_v4  ;;  %v1436_v11 = vadd.f32 %v2164_v61, %v1305_v5 }
 0x16b   : > { %v1341_v12 = vadd.f32 %v2164_v61, %v1210_v8  ;;  %v1373_v13 = vadd.f32 %v2164_v61, %v1242_v9 }
 0x16c   : > { %1532 = vst [vmem:[%s2175_s9 + $0x2b8] sm:$0xff] %v1404_v10 }
 0x16d   : > { %1564 = vst [vmem:[%s2175_s9 + $0x3b8] sm:$0xff] %v1436_v11 }
 0x16e   : > { %1469 = vst [vmem:[%s2175_s9 + $0xc0] sm:$0xff] %v1341_v12 }
 0x16f   : > { %1501 = vst [vmem:[%s2175_s9 + $0x1c0] sm:$0xff] %v1373_v13  ;;  %v1083_v14 = vpop.f32.mrf.mxu2  ;;  %v1163_v15 = vpop.f32.mrf.mxu3 }
 0x170   : > { %v1274_v16 = vmul.f32 %v2161_v60, %v1083_v14  ;;  %v1306_v17 = vmul.f32 %v2161_v60, %v1163_v15  ;;  %v925_v18 = vpop.f32.mrf.mxu0  ;;  %v1005_v19 = vpop.f32.mrf.mxu1 }
 0x171   : > { %v1211_v20 = vmul.f32 %v2161_v60, %v925_v18  ;;  %v1243_v21 = vmul.f32 %v2161_v60, %v1005_v19 }
 0x172   : > { %v1405_v22 = vadd.f32 %v2164_v61, %v1274_v16  ;;  %v1437_v23 = vadd.f32 %v2164_v61, %v1306_v17 }
 0x173   : > { %v1342_v24 = vadd.f32 %v2164_v61, %v1211_v20  ;;  %v1374_v25 = vadd.f32 %v2164_v61, %v1243_v21 }
 0x174   : > { %1533 = vst [vmem:[%s2175_s9 + $0x2c0] sm:$0xff] %v1405_v22 }
 0x175   : > { %1565 = vst [vmem:[%s2175_s9 + $0x3c0] sm:$0xff] %v1437_v23 }
 0x176   : > { %1470 = vst [vmem:[%s2175_s9 + $0xc8] sm:$0xff] %v1342_v24 }
 0x177   : > { %1502 = vst [vmem:[%s2175_s9 + $0x1c8] sm:$0xff] %v1374_v25  ;;  %v1085_v26 = vpop.f32.mrf.mxu2  ;;  %v1165_v27 = vpop.f32.mrf.mxu3 }
 0x178   : > { %v1275_v28 = vmul.f32 %v2161_v60, %v1085_v26  ;;  %v1307_v29 = vmul.f32 %v2161_v60, %v1165_v27  ;;  %v928_v30 = vpop.f32.mrf.mxu0  ;;  %v1008_v31 = vpop.f32.mrf.mxu1 }
 0x179   : > { %v1212_v32 = vmul.f32 %v2161_v60, %v928_v30  ;;  %v1244_v33 = vmul.f32 %v2161_v60, %v1008_v31 }
 0x17a   : > { %v1406_v34 = vadd.f32 %v2164_v61, %v1275_v28  ;;  %v1438_v35 = vadd.f32 %v2164_v61, %v1307_v29 }
 0x17b   : > { %v1343_v36 = vadd.f32 %v2164_v61, %v1212_v32  ;;  %v1375_v37 = vadd.f32 %v2164_v61, %v1244_v33 }
 0x17c   : > { %1534 = vst [vmem:[%s2175_s9 + $0x2c8] sm:$0xff] %v1406_v34 }
 0x17d   : > { %1566 = vst [vmem:[%s2175_s9 + $0x3c8] sm:$0xff] %v1438_v35 }
 0x17e   : > { %1471 = vst [vmem:[%s2175_s9 + $0xd0] sm:$0xff] %v1343_v36 }
 0x17f   : > { %1503 = vst [vmem:[%s2175_s9 + $0x1d0] sm:$0xff] %v1375_v37  ;;  %v1088_v38 = vpop.f32.mrf.mxu2  ;;  %v1168_v39 = vpop.f32.mrf.mxu3 }
 0x180   : > { %v1276_v40 = vmul.f32 %v2161_v60, %v1088_v38  ;;  %v1308_v41 = vmul.f32 %v2161_v60, %v1168_v39  ;;  %v930_v42 = vpop.f32.mrf.mxu0  ;;  %v1010_v43 = vpop.f32.mrf.mxu1 }
 0x181   : > { %v1213_v44 = vmul.f32 %v2161_v60, %v930_v42  ;;  %v1245_v45 = vmul.f32 %v2161_v60, %v1010_v43 }
 0x182   : > { %v1407_v46 = vadd.f32 %v2164_v61, %v1276_v40  ;;  %v1439_v47 = vadd.f32 %v2164_v61, %v1308_v41 }
 0x183   : > { %v1344_v48 = vadd.f32 %v2164_v61, %v1213_v44  ;;  %v1376_v49 = vadd.f32 %v2164_v61, %v1245_v45 }
 0x184   : > { %1535 = vst [vmem:[%s2175_s9 + $0x2d0] sm:$0xff] %v1407_v46 }
 0x185   : > { %1567 = vst [vmem:[%s2175_s9 + $0x3d0] sm:$0xff] %v1439_v47 }
 0x186   : > { %1472 = vst [vmem:[%s2175_s9 + $0xd8] sm:$0xff] %v1344_v48 }
 0x187   : > { %1504 = vst [vmem:[%s2175_s9 + $0x1d8] sm:$0xff] %v1376_v49  ;;  %v1090_v50 = vpop.f32.mrf.mxu2  ;;  %v1170_v51 = vpop.f32.mrf.mxu3 }
 0x188   : > { %v1277_v52 = vmul.f32 %v2161_v60, %v1090_v50  ;;  %v1309_v53 = vmul.f32 %v2161_v60, %v1170_v51  ;;  %v933_v54 = vpop.f32.mrf.mxu0  ;;  %v1013_v55 = vpop.f32.mrf.mxu1 }
 0x189   : > { %v1214_v56 = vmul.f32 %v2161_v60, %v933_v54  ;;  %v1246_v57 = vmul.f32 %v2161_v60, %v1013_v55 }
 0x18a   : > { %v1408_v58 = vadd.f32 %v2164_v61, %v1277_v52  ;;  %v1440_v59 = vadd.f32 %v2164_v61, %v1309_v53 }
 0x18b   : > { %v1345_v62 = vadd.f32 %v2164_v61, %v1214_v56  ;;  %v1377_v63 = vadd.f32 %v2164_v61, %v1246_v57 }
 0x18c   : > { %1536 = vst [vmem:[%s2175_s9 + $0x2d8] sm:$0xff] %v1408_v58 }
 0x18d   : > { %1568 = vst [vmem:[%s2175_s9 + $0x3d8] sm:$0xff] %v1440_v59 }
 0x18e   : > { %1473 = vst [vmem:[%s2175_s9 + $0xe0] sm:$0xff] %v1345_v62 }
 0x18f   : > { %1505 = vst [vmem:[%s2175_s9 + $0x1e0] sm:$0xff] %v1377_v63  ;;  %v1093_v0 = vpop.f32.mrf.mxu2  ;;  %v1173_v1 = vpop.f32.mrf.mxu3 }
 0x190   : > { %v1278_v2 = vmul.f32 %v2161_v60, %v1093_v0  ;;  %v1310_v3 = vmul.f32 %v2161_v60, %v1173_v1  ;;  %v935_v4 = vpop.f32.mrf.mxu0  ;;  %v1015_v5 = vpop.f32.mrf.mxu1 }
 0x191   : > { %v1215_v6 = vmul.f32 %v2161_v60, %v935_v4  ;;  %v1247_v7 = vmul.f32 %v2161_v60, %v1015_v5 }
 0x192   : > { %v1409_v8 = vadd.f32 %v2164_v61, %v1278_v2  ;;  %v1441_v9 = vadd.f32 %v2164_v61, %v1310_v3 }
 0x193   : > { %v1346_v10 = vadd.f32 %v2164_v61, %v1215_v6  ;;  %v1378_v11 = vadd.f32 %v2164_v61, %v1247_v7 }
 0x194   : > { %1537 = vst [vmem:[%s2175_s9 + $0x2e0] sm:$0xff] %v1409_v8 }
 0x195   : > { %1569 = vst [vmem:[%s2175_s9 + $0x3e0] sm:$0xff] %v1441_v9 }
 0x196   : > { %1474 = vst [vmem:[%s2175_s9 + $0xe8] sm:$0xff] %v1346_v10 }
 0x197   : > { %1506 = vst [vmem:[%s2175_s9 + $0x1e8] sm:$0xff] %v1378_v11  ;;  %v1095_v12 = vpop.f32.mrf.mxu2  ;;  %v1175_v13 = vpop.f32.mrf.mxu3 }
 0x198   : > { %v1279_v14 = vmul.f32 %v2161_v60, %v1095_v12  ;;  %v1311_v15 = vmul.f32 %v2161_v60, %v1175_v13  ;;  %v938_v16 = vpop.f32.mrf.mxu0  ;;  %v1018_v17 = vpop.f32.mrf.mxu1 }
 0x199   : > { %v1216_v18 = vmul.f32 %v2161_v60, %v938_v16  ;;  %v1248_v19 = vmul.f32 %v2161_v60, %v1018_v17 }
 0x19a   : > { %v1410_v20 = vadd.f32 %v2164_v61, %v1279_v14  ;;  %v1442_v21 = vadd.f32 %v2164_v61, %v1311_v15 }
 0x19b   : > { %v1347_v22 = vadd.f32 %v2164_v61, %v1216_v18  ;;  %v1379_v23 = vadd.f32 %v2164_v61, %v1248_v19 }
 0x19c   : > { %1538 = vst [vmem:[%s2175_s9 + $0x2e8] sm:$0xff] %v1410_v20 }
 0x19d   : > { %1570 = vst [vmem:[%s2175_s9 + $0x3e8] sm:$0xff] %v1442_v21 }
 0x19e   : > { %1475 = vst [vmem:[%s2175_s9 + $0xf0] sm:$0xff] %v1347_v22 }
 0x19f   : > { %1507 = vst [vmem:[%s2175_s9 + $0x1f0] sm:$0xff] %v1379_v23  ;;  %v1098_v24 = vpop.f32.mrf.mxu2  ;;  %v1178_v25 = vpop.f32.mrf.mxu3 }
 0x1a0   : > { %v1280_v26 = vmul.f32 %v2161_v60, %v1098_v24  ;;  %v1312_v27 = vmul.f32 %v2161_v60, %v1178_v25  ;;  %v940_v28 = vpop.f32.mrf.mxu0  ;;  %v1020_v29 = vpop.f32.mrf.mxu1 }
 0x1a1   : > { %v1217_v30 = vmul.f32 %v2161_v60, %v940_v28  ;;  %v1249_v31 = vmul.f32 %v2161_v60, %v1020_v29 }
 0x1a2   : > { %v1411_v32 = vadd.f32 %v2164_v61, %v1280_v26  ;;  %v1443_v33 = vadd.f32 %v2164_v61, %v1312_v27 }
 0x1a3   : > { %v1348_v34 = vadd.f32 %v2164_v61, %v1217_v30  ;;  %v1380_v35 = vadd.f32 %v2164_v61, %v1249_v31 }
 0x1a4   : > { %1539 = vst [vmem:[%s2175_s9 + $0x2f0] sm:$0xff] %v1411_v32 }
 0x1a5   : > { %1571 = vst [vmem:[%s2175_s9 + $0x3f0] sm:$0xff] %v1443_v33 }
 0x1a6   : > { %1476 = vst [vmem:[%s2175_s9 + $0xf8] sm:$0xff] %v1348_v34 }
 0x1a7   : > { %1508 = vst [vmem:[%s2175_s9 + $0x1f8] sm:$0xff] %v1380_v35  ;;  %v1100_v36 = vpop.f32.mrf.mxu2  ;;  %v1180_v37 = vpop.f32.mrf.mxu3 }
 0x1a8   : > { %v1281_v38 = vmul.f32 %v2161_v60, %v1100_v36  ;;  %v1313_v39 = vmul.f32 %v2161_v60, %v1180_v37 }
 0x1aa   : > { %v1412_v40 = vadd.f32 %v2164_v61, %v1281_v38  ;;  %v1444_v41 = vadd.f32 %v2164_v61, %v1313_v39 }
 0x1ac   : > { %1540 = vst [vmem:[%s2175_s9 + $0x2f8] sm:$0xff] %v1412_v40 }
 0x1ad   : > { %1572 = vst [vmem:[%s2175_s9 + $0x3f8] sm:$0xff] %v1444_v41 }
 0x1ae PF: > { %s16_s21 = sadd.s32 1, %s2040_s21  }
 0x1af   : > { %p13_p4 = scmp.ge.s32.totalorder %s16_s21, 4  }
 0x1b1   :  { %15 = sbr.rel (!%p13_p4) target bundleno = 1 (0x1), region = 74 }

</bundles_post_ra>
